<compile_context>
chip_gen: v7x
topology: tpu7x:2x2x1
jax: 0.10.0
libtpu: 0.0.40
codegen_flags: <defaults>
</compile_context>

<pallas_src>
import functools
import math

import jax
import jax.numpy as jnp
from jax import lax
from jax.experimental import pallas as pl
from jax.experimental.pallas import tpu as pltpu


def _round_up(x, m):
    return ((x + m - 1) // m) * m


# --------------------------------------------------------------------------
# Pallas kernel: one LSTM layer, T_CHUNK timesteps per grid step.
# grid = (batch_tiles, time_chunks); time (axis 1) is innermost/sequential,
# h/c carried in VMEM scratch and re-initialized from h0/c0 at t == 0 for
# each batch tile.  px_ref holds the precomputed input projection for the
# current (batch tile, time chunk), gates already reordered to
# [input, forget, output, cell] and hidden padded to Hp (multiple of 128).
# --------------------------------------------------------------------------
def _lstm_layer_kernel(px_ref, whh_ifo_ref, whh_g_ref, h0_ref, c0_ref,
                       hs_ref, h_scr, c_scr, *, unroll):
    @pl.when(pl.program_id(1) == 0)
    def _():
        h_scr[...] = h0_ref[...]
        c_scr[...] = c0_ref[...]

    T = px_ref.shape[0]            # timesteps per chunk (static)
    Hp = h_scr.shape[-1]           # padded hidden size (multiple of 128)
    w_ifo = whh_ifo_ref[...]       # (Hp, 3*Hp), resident single copy in VMEM
    w_g = whh_g_ref[...]           # (Hp, Hp)
    mm_dtype = w_ifo.dtype

    def step(t, carry):
        h, c = carry
        h_mm = h.astype(mm_dtype)
        px = px_ref[t]             # (Bt, 4*Hp), bf16 (default) or f32
        # Recurrent matmul split along the gate (N) axis so the fused sigmoid
        # over the [i, f, o] block overlaps the cell-gate matmul tail.
        pre_ifo = px[:, :3 * Hp].astype(jnp.float32) + jnp.dot(
            h_mm, w_ifo, preferred_element_type=jnp.float32)
        pre_g = px[:, 3 * Hp:].astype(jnp.float32) + jnp.dot(
            h_mm, w_g, preferred_element_type=jnp.float32)
        sig = jax.nn.sigmoid(pre_ifo)          # one EUP pass over 3*Hp lanes
        i_g = sig[:, 0:Hp]
        f_g = sig[:, Hp:2 * Hp]
        o_g = sig[:, 2 * Hp:3 * Hp]
        g_g = jnp.tanh(pre_g)                  # one tanh pass over Hp lanes
        c_new = c * f_g + i_g * g_g
        h_new = o_g * jnp.tanh(c_new)
        hs_ref[t] = h_new                      # lane-dense (Bt, Hp) store
        return h_new, c_new

    h, c = lax.fori_loop(0, T, step, (h_scr[...], c_scr[...]), unroll=unroll)
    h_scr[...] = h
    c_scr[...] = c
    # NOTE: final cell state stays in scratch; the reference module never
    # consumes c (output_cs is built from hs[-1]), so cs is not streamed out.


def lstm_layer_pallas(x, w_ih, b_ih, w_hh, b_hh, h0, c0,
                      *, t_chunk=32, unroll=8, matmul_dtype=jnp.bfloat16):
    """Run one LSTM layer over the whole sequence.

    x:  (S, B, In)  float32
    w_ih: (4H, In)  b_ih: (4H,)   (PyTorch nn.Linear layout, gate order i,f,g,o)
    w_hh: (4H, H)   b_hh: (4H,)
    h0, c0: (B, H)
    returns hs of shape (S, B, H), float32.

    matmul_dtype: bf16 by default (W_hh and the hoisted preact stream are
    stored in bf16; gate/state math stays f32). Pass jnp.float32 for
    bit-tighter accuracy.
    """
    S, B, In = x.shape
    H = h0.shape[-1]
    Hp = _round_up(H, 128)                       # lane-aligned hidden
    f32 = jnp.float32
    use_bf16 = (jnp.dtype(matmul_dtype) == jnp.dtype(jnp.bfloat16))
    px_dtype = jnp.bfloat16 if use_bf16 else f32

    # ---- time chunking ----
    t_chunk_eff = max(1, min(t_chunk, S))
    Sp = _round_up(S, t_chunk_eff)
    unroll_eff = max(1, min(unroll, t_chunk_eff))

    # ---- batch tiling (2 tiles -> both TensorCores on v7x; 1 elsewhere) ----
    if _round_up(B, 8) >= 16:
        Bp = _round_up(B, 16)
        n_bt = 2
    else:
        Bp = _round_up(B, 8)
        n_bt = 1
    b_tile = Bp // n_bt                          # multiple of 8

    order = jnp.array([0, 1, 3, 2])              # [i, f, g, o] -> [i, f, o, g]

    def reorder_pad_w(w, in_dim):                # (4H, in_dim) -> (4*Hp, in_dim)
        w4 = jnp.asarray(w, f32).reshape(4, H, in_dim)[order]
        w4 = jnp.pad(w4, ((0, 0), (0, Hp - H), (0, 0)))
        return w4.reshape(4 * Hp, in_dim)

    wih_r = reorder_pad_w(w_ih, In)                            # (4Hp, In)
    whh_r = reorder_pad_w(w_hh, H)                             # (4Hp, H)
    whh_rt = jnp.pad(whh_r, ((0, 0), (0, Hp - H))).T           # (Hp, 4Hp)
    whh_rt = whh_rt.astype(matmul_dtype)
    whh_ifo = whh_rt[:, :3 * Hp]                               # (Hp, 3Hp)
    whh_g = whh_rt[:, 3 * Hp:]                                 # (Hp, Hp)

    b4 = (jnp.asarray(b_ih, f32) + jnp.asarray(b_hh, f32)).reshape(4, H)[order]
    b_r = jnp.pad(b4, ((0, 0), (0, Hp - H))).reshape(4 * Hp)   # (4Hp,), f32

    # -- hoisted input projection: one large f32 matmul over the whole sequence --
    preact_x = jnp.einsum('sbi,gi->sbg', jnp.asarray(x, f32), wih_r) + b_r
    if Sp != S or Bp != B:
        preact_x = jnp.pad(preact_x, ((0, Sp - S), (0, Bp - B), (0, 0)))
    if preact_x.dtype != px_dtype:
        preact_x = preact_x.astype(px_dtype)     # bf16 stream halves px HBM traffic

    h0p = jnp.asarray(h0, f32)
    c0p = jnp.asarray(c0, f32)
    if Bp != B or Hp != H:
        h0p = jnp.pad(h0p, ((0, Bp - B), (0, Hp - H)))
        c0p = jnp.pad(c0p, ((0, Bp - B), (0, Hp - H)))

    # ---- explicit VMEM budget (sized with v7x's 64 MiB in mind) ----
    mm_bytes = jnp.dtype(matmul_dtype).itemsize
    px_bytes = jnp.dtype(px_dtype).itemsize
    needed = (Hp * 4 * Hp * mm_bytes                              # resident W_hh
              + 2 * t_chunk_eff * b_tile * 4 * Hp * px_bytes      # px (double buf)
              + 2 * t_chunk_eff * b_tile * Hp * 4                 # hs (double buf)
              + 4 * b_tile * Hp * 4                               # h0/c0 buffers
              + 2 * b_tile * Hp * 4)                              # h/c scratch
    vmem_limit = int(min(max(needed + (8 << 20), 32 << 20), 112 << 20))

    kernel = functools.partial(_lstm_layer_kernel, unroll=unroll_eff)

    hs = pl.pallas_call(
        kernel,
        out_shape=jax.ShapeDtypeStruct((Sp, Bp, Hp), f32),
        grid_spec=pltpu.PrefetchScalarGridSpec(
            num_scalar_prefetch=0,
            grid=(n_bt, Sp // t_chunk_eff),
            in_specs=[
                # preact_x chunk for (batch tile, time chunk)
                pl.BlockSpec((t_chunk_eff, b_tile, 4 * Hp),
                             lambda b, t: (t, b, 0)),
                # recurrent weights: whole-array VMEM operands (single copy,
                # no double-buffering)
                pl.BlockSpec(memory_space=pltpu.MemorySpace.VMEM),   # W_hh[:, ifo]
                pl.BlockSpec(memory_space=pltpu.MemorySpace.VMEM),   # W_hh[:, g]
                # initial state blocks per batch tile (tiny)
                pl.BlockSpec((b_tile, Hp), lambda b, t: (b, 0)),     # h0
                pl.BlockSpec((b_tile, Hp), lambda b, t: (b, 0)),     # c0
            ],
            out_specs=pl.BlockSpec((t_chunk_eff, b_tile, Hp),
                                   lambda b, t: (t, b, 0)),
            scratch_shapes=[pltpu.VMEM((b_tile, Hp), f32),   # h carry
                            pltpu.VMEM((b_tile, Hp), f32)],  # c carry
        ),
        compiler_params=pltpu.CompilerParams(
            # batch tiles independent (both TCs on v7x); time strictly serial
            dimension_semantics=("parallel", "arbitrary"),
            vmem_limit_bytes=vmem_limit),
    )(preact_x, whh_ifo, whh_g, h0p, c0p)

    if Sp != S or Bp != B or Hp != H:
        hs = hs[:S, :B, :H]
    return hs


# --------------------------------------------------------------------------
# Full module forward (stacked layers) -- mirrors LSTM.forward (batch_first=False)
# --------------------------------------------------------------------------
def lstm_forward(x, hidden_states, params, num_layers, dropout=0.0,
                 *, t_chunk=32, matmul_dtype=jnp.bfloat16):
    """x: (S, B, In); hidden_states: (h0, c0) each (num_layers, B, H)."""
    h0_all, c0_all = hidden_states
    output_hs, output_cs = [], []
    hs = x
    for layer in range(num_layers):
        w_ih, b_ih, w_hh, b_hh = params[layer]
        hs = lstm_layer_pallas(x, w_ih, b_ih, w_hh, b_hh,
                               h0_all[layer], c0_all[layer],
                               t_chunk=t_chunk, matmul_dtype=matmul_dtype)
        # TODO(synk): inter-layer nn.Dropout skipped (dropout=0 in this config).
        x = hs
        output_hs.append(hs[-1])
        # NOTE: reference code appends hs[-1] (not cs[-1]) to output_cs for
        # batch_first=False; reproduced, so the cs stream is never needed.
        output_cs.append(hs[-1])
    output_hs = jnp.stack(output_hs, axis=0)
    output_cs = jnp.stack(output_cs, axis=0)
    return hs, (output_hs, output_cs)


# --------------------------------------------------------------------------
# Pure-JAX reference (same math, original gate order) for correctness check
# --------------------------------------------------------------------------
def lstm_forward_ref(x, hidden_states, params, num_layers):
    h0_all, c0_all = hidden_states
    output_hs, output_cs = [], []
    hs = x
    for layer in range(num_layers):
        w_ih, b_ih, w_hh, b_hh = params[layer]
        h, c = h0_all[layer], c0_all[layer]
        hs_list = []
        for t in range(x.shape[0]):
            preact = x[t] @ w_ih.T + b_ih + h @ w_hh.T + b_hh
            H = h.shape[-1]
            i_g = jax.nn.sigmoid(preact[:, 0:H])
            f_g = jax.nn.sigmoid(preact[:, H:2 * H])
            g_g = jnp.tanh(preact[:, 2 * H:3 * H])
            o_g = jax.nn.sigmoid(preact[:, 3 * H:4 * H])
            c = c * f_g + i_g * g_g
            h = o_g * jnp.tanh(c)
            hs_list.append(h)
        hs = jnp.stack(hs_list, axis=0)
        x = hs
        output_hs.append(hs[-1])
        output_cs.append(hs[-1])
    return hs, (jnp.stack(output_hs, 0), jnp.stack(output_cs, 0))


# --------------------------------------------------------------------------
# Deterministic parameter init (matches reset_parameters: U(-1/sqrt(H), 1/sqrt(H)))
# --------------------------------------------------------------------------
def init_params(key, input_size, hidden_size, num_layers):
    std = 1.0 / math.sqrt(hidden_size)
    params = []
    for layer in range(num_layers):
        in_sz = input_size if layer == 0 else hidden_size
        key, k1, k2, k3, k4 = jax.random.split(key, 5)
        w_ih = jax.random.uniform(k1, (4 * hidden_size, in_sz),
                                  jnp.float32, -std, std)
        b_ih = jax.random.uniform(k2, (4 * hidden_size,),
                                  jnp.float32, -std, std)
        # TODO(synk): wdrop (F.dropout on h2h.weight at __init__) is stochastic;
        # omitted here since parameters are synthetic/deterministic.
        w_hh = jax.random.uniform(k3, (4 * hidden_size, hidden_size),
                                  jnp.float32, -std, std)
        b_hh = jax.random.uniform(k4, (4 * hidden_size,),
                                  jnp.float32, -std, std)
        params.append((w_ih, b_ih, w_hh, b_hh))
    return params


if __name__ == "__main__":
    SEQ, BATCH, INPUT, HIDDEN, LAYERS = 8, 4, 16, 32, 2

    key = jax.random.PRNGKey(0)
    key, kx = jax.random.split(key)
    x = jax.random.normal(kx, (SEQ, BATCH, INPUT), jnp.float32)
    params = init_params(key, INPUT, HIDDEN, LAYERS)

    h0 = jnp.zeros((LAYERS, BATCH, HIDDEN), jnp.float32)
    c0 = jnp.zeros((LAYERS, BATCH, HIDDEN), jnp.float32)

    hs_ref, (out_hs_ref, out_cs_ref) = lstm_forward_ref(x, (h0, c0), params, LAYERS)

    # ---- strict correctness check of the kernel logic (f32 matmul path) ----
    hs32, (out_hs32, out_cs32) = lstm_forward(x, (h0, c0), params, LAYERS,
                                              matmul_dtype=jnp.float32)
    jax.block_until_ready((hs32, out_hs32, out_cs32))
    assert hs32.shape == (SEQ, BATCH, HIDDEN)
    assert out_hs32.shape == (LAYERS, BATCH, HIDDEN)
    assert out_cs32.shape == (LAYERS, BATCH, HIDDEN)
    assert jnp.allclose(hs32, hs_ref, atol=5e-5, rtol=5e-5)
    assert jnp.allclose(out_hs32, out_hs_ref, atol=5e-5, rtol=5e-5)
    assert jnp.allclose(out_cs32, out_cs_ref, atol=5e-5, rtol=5e-5)

    # ---- default fast path (bf16 recurrent matmul / px stream) ----
    hs, (out_hs, out_cs) = lstm_forward(x, (h0, c0), params, LAYERS)
    jax.block_until_ready((hs, out_hs, out_cs))
    assert hs.shape == (SEQ, BATCH, HIDDEN)
    assert jnp.allclose(hs, hs_ref, atol=5e-2, rtol=5e-2)
    assert jnp.allclose(out_hs, out_hs_ref, atol=5e-2, rtol=5e-2)
    assert jnp.allclose(out_cs, out_cs_ref, atol=5e-2, rtol=5e-2)

    print("KERNEL_OK")
</pallas_src>

<mosaic_0001>
module attributes {stable_mosaic.version = 11 : i64} {
  func.func @_lstm_layer_kernel(%arg0: i32, %arg1: i32, %arg2: memref<8x8x512xf32, #tpu.memory_space<vmem>>, %arg3: memref<128x384xf32, #tpu.memory_space<vmem>>, %arg4: memref<128x128xf32, #tpu.memory_space<vmem>>, %arg5: memref<8x128xf32, #tpu.memory_space<vmem>>, %arg6: memref<8x128xf32, #tpu.memory_space<vmem>>, %arg7: memref<8x8x128xf32, #tpu.memory_space<vmem>>, %arg8: memref<8x128xf32, #tpu.memory_space<vmem>>, %arg9: memref<8x128xf32, #tpu.memory_space<vmem>>) attributes {dimension_semantics = [#tpu.dimension_semantics<parallel>, #tpu.dimension_semantics<arbitrary>], iteration_bounds = array<i64: 1, 1>, scalar_prefetch = 0 : i64, scratch_operands = 2 : i64, tpu.core_type = #tpu.core_type<tc>, window_params = [{transform_indices = @transform_0, window_bounds = array<i64: 8, 8, 512>}, {pipeline_mode = #tpu.pipeline_mode<synchronous>, transform_indices = @transform_1, window_bounds = array<i64: 128, 384>}, {pipeline_mode = #tpu.pipeline_mode<synchronous>, transform_indices = @transform_2, window_bounds = array<i64: 128, 128>}, {transform_indices = @transform_3, window_bounds = array<i64: 8, 128>}, {transform_indices = @transform_4, window_bounds = array<i64: 8, 128>}, {transform_indices = @transform_5, window_bounds = array<i64: 8, 8, 128>}]} {
    %c0_i32 = arith.constant 0 : i32
    %0 = arith.cmpi eq, %arg1, %c0_i32 : i32
    %1 = arith.extui %0 : i1 to i32
    %c0_i32_0 = arith.constant 0 : i32
    %2 = arith.cmpi ne, %1, %c0_i32_0 : i32
    scf.if %2 {
      %c0_68 = arith.constant 0 : index
      %c0_69 = arith.constant 0 : index
      %225 = vector.load %arg5[%c0_68, %c0_69] : memref<8x128xf32, #tpu.memory_space<vmem>>, vector<8x128xf32>
      %c0_70 = arith.constant 0 : index
      %c0_71 = arith.constant 0 : index
      %226 = vector.load %arg8[%c0_70, %c0_71] : memref<8x128xf32, #tpu.memory_space<vmem>>, vector<8x128xf32>
      tpu.vector_store %arg8[%c0_70, %c0_71], %225 {strides = array<i32>} : memref<8x128xf32, #tpu.memory_space<vmem>>, vector<8x128xf32>,
      %c0_72 = arith.constant 0 : index
      %c0_73 = arith.constant 0 : index
      %227 = vector.load %arg6[%c0_72, %c0_73] : memref<8x128xf32, #tpu.memory_space<vmem>>, vector<8x128xf32>
      %c0_74 = arith.constant 0 : index
      %c0_75 = arith.constant 0 : index
      %228 = vector.load %arg9[%c0_74, %c0_75] : memref<8x128xf32, #tpu.memory_space<vmem>>, vector<8x128xf32>
      tpu.vector_store %arg9[%c0_74, %c0_75], %227 {strides = array<i32>} : memref<8x128xf32, #tpu.memory_space<vmem>>, vector<8x128xf32>,
    } else {
    }
    %c0 = arith.constant 0 : index
    %c0_1 = arith.constant 0 : index
    %3 = vector.load %arg3[%c0, %c0_1] : memref<128x384xf32, #tpu.memory_space<vmem>>, vector<128x384xf32>
    %c0_2 = arith.constant 0 : index
    %c0_3 = arith.constant 0 : index
    %4 = vector.load %arg4[%c0_2, %c0_3] : memref<128x128xf32, #tpu.memory_space<vmem>>, vector<128x128xf32>
    %c0_4 = arith.constant 0 : index
    %c0_5 = arith.constant 0 : index
    %5 = vector.load %arg8[%c0_4, %c0_5] : memref<8x128xf32, #tpu.memory_space<vmem>>, vector<8x128xf32>
    %c0_6 = arith.constant 0 : index
    %c0_7 = arith.constant 0 : index
    %6 = vector.load %arg9[%c0_6, %c0_7] : memref<8x128xf32, #tpu.memory_space<vmem>>, vector<8x128xf32>
    %c0_i32_8 = arith.constant 0 : i32
    %7 = arith.index_cast %c0_i32_8 : i32 to index
    %c0_9 = arith.constant 0 : index
    %c0_10 = arith.constant 0 : index
    %8 = vector.load %arg2[%7, %c0_9, %c0_10] : memref<8x8x512xf32, #tpu.memory_space<vmem>>, vector<1x8x512xf32>
    %9 = vector.shape_cast %8 : vector<1x8x512xf32> to vector<8x512xf32>
    %10 = vector.extract_strided_slice %9 {offsets = [0, 0], sizes = [8, 384], strides = [1, 1]} : vector<8x512xf32> to vector<8x384xf32>
    %cst = arith.constant dense<0.000000e+00> : vector<8x384xf32>
    %11 = tpu.matmul %5, %3, %cst {dimension_numbers = #tpu.dot_dimension_numbers<[1], [0], [0], [1], [0, 0, 1, 1], [], []>} : vector<8x128xf32>, vector<128x384xf32>, vector<8x384xf32> -> vector<8x384xf32>
    %12 = arith.addf %10, %11 : vector<8x384xf32>
    %13 = vector.extract_strided_slice %9 {offsets = [0, 384], sizes = [8, 128], strides = [1, 1]} : vector<8x512xf32> to vector<8x128xf32>
    %cst_11 = arith.constant dense<0.000000e+00> : vector<8x128xf32>
    %14 = tpu.matmul %5, %4, %cst_11 {dimension_numbers = #tpu.dot_dimension_numbers<[1], [0], [0], [1], [0, 0, 1, 1], [], []>} : vector<8x128xf32>, vector<128x128xf32>, vector<8x128xf32> -> vector<8x128xf32>
    %15 = arith.addf %13, %14 : vector<8x128xf32>
    %16 = arith.negf %12 : vector<8x384xf32>
    %17 = math.exp %16 : vector<8x384xf32>
    %cst_12 = arith.constant 1.000000e+00 : f32
    %18 = vector.broadcast %cst_12 : f32 to vector<8x384xf32>
    %19 = arith.addf %18, %17 : vector<8x384xf32>
    %20 = arith.divf %18, %19 : vector<8x384xf32>
    %21 = vector.extract_strided_slice %20 {offsets = [0, 0], sizes = [8, 128], strides = [1, 1]} : vector<8x384xf32> to vector<8x128xf32>
    %22 = vector.extract_strided_slice %20 {offsets = [0, 128], sizes = [8, 128], strides = [1, 1]} : vector<8x384xf32> to vector<8x128xf32>
    %23 = vector.extract_strided_slice %20 {offsets = [0, 256], sizes = [8, 128], strides = [1, 1]} : vector<8x384xf32> to vector<8x128xf32>
    %24 = math.tanh %15 : vector<8x128xf32>
    %25 = arith.mulf %6, %22 : vector<8x128xf32>
    %26 = arith.mulf %21, %24 : vector<8x128xf32>
    %27 = arith.addf %25, %26 : vector<8x128xf32>
    %28 = math.tanh %27 : vector<8x128xf32>
    %29 = arith.mulf %23, %28 : vector<8x128xf32>
    %30 = arith.index_cast %c0_i32_8 : i32 to index
    %c0_13 = arith.constant 0 : index
    %c0_14 = arith.constant 0 : index
    %31 = vector.load %arg7[%30, %c0_13, %c0_14] : memref<8x8x128xf32, #tpu.memory_space<vmem>>, vector<1x8x128xf32>
    %32 = vector.shape_cast %31 : vector<1x8x128xf32> to vector<8x128xf32>
    %33 = vector.shape_cast %29 : vector<8x128xf32> to vector<1x8x128xf32>
    tpu.vector_store %arg7[%30, %c0_13, %c0_14], %33 {strides = array<i32>} : memref<8x8x128xf32, #tpu.memory_space<vmem>>, vector<1x8x128xf32>,
    %c1_i32 = arith.constant 1 : i32
    %34 = arith.index_cast %c1_i32 : i32 to index
    %c0_15 = arith.constant 0 : index
    %c0_16 = arith.constant 0 : index
    %35 = vector.load %arg2[%34, %c0_15, %c0_16] : memref<8x8x512xf32, #tpu.memory_space<vmem>>, vector<1x8x512xf32>
    %36 = vector.shape_cast %35 : vector<1x8x512xf32> to vector<8x512xf32>
    %37 = vector.extract_strided_slice %36 {offsets = [0, 0], sizes = [8, 384], strides = [1, 1]} : vector<8x512xf32> to vector<8x384xf32>
    %cst_17 = arith.constant dense<0.000000e+00> : vector<8x384xf32>
    %38 = tpu.matmul %29, %3, %cst_17 {dimension_numbers = #tpu.dot_dimension_numbers<[1], [0], [0], [1], [0, 0, 1, 1], [], []>} : vector<8x128xf32>, vector<128x384xf32>, vector<8x384xf32> -> vector<8x384xf32>
    %39 = arith.addf %37, %38 : vector<8x384xf32>
    %40 = vector.extract_strided_slice %36 {offsets = [0, 384], sizes = [8, 128], strides = [1, 1]} : vector<8x512xf32> to vector<8x128xf32>
    %cst_18 = arith.constant dense<0.000000e+00> : vector<8x128xf32>
    %41 = tpu.matmul %29, %4, %cst_18 {dimension_numbers = #tpu.dot_dimension_numbers<[1], [0], [0], [1], [0, 0, 1, 1], [], []>} : vector<8x128xf32>, vector<128x128xf32>, vector<8x128xf32> -> vector<8x128xf32>
    %42 = arith.addf %40, %41 : vector<8x128xf32>
    %43 = arith.negf %39 : vector<8x384xf32>
    %44 = math.exp %43 : vector<8x384xf32>
    %cst_19 = arith.constant 1.000000e+00 : f32
    %45 = vector.broadcast %cst_19 : f32 to vector<8x384xf32>
    %46 = arith.addf %45, %44 : vector<8x384xf32>
    %47 = arith.divf %45, %46 : vector<8x384xf32>
    %48 = vector.extract_strided_slice %47 {offsets = [0, 0], sizes = [8, 128], strides = [1, 1]} : vector<8x384xf32> to vector<8x128xf32>
    %49 = vector.extract_strided_slice %47 {offsets = [0, 128], sizes = [8, 128], strides = [1, 1]} : vector<8x384xf32> to vector<8x128xf32>
    %50 = vector.extract_strided_slice %47 {offsets = [0, 256], sizes = [8, 128], strides = [1, 1]} : vector<8x384xf32> to vector<8x128xf32>
    %51 = math.tanh %42 : vector<8x128xf32>
    %52 = arith.mulf %27, %49 : vector<8x128xf32>
    %53 = arith.mulf %48, %51 : vector<8x128xf32>
    %54 = arith.addf %52, %53 : vector<8x128xf32>
    %55 = math.tanh %54 : vector<8x128xf32>
    %56 = arith.mulf %50, %55 : vector<8x128xf32>
    %57 = arith.index_cast %c1_i32 : i32 to index
    %c0_20 = arith.constant 0 : index
    %c0_21 = arith.constant 0 : index
    %58 = vector.load %arg7[%57, %c0_20, %c0_21] : memref<8x8x128xf32, #tpu.memory_space<vmem>>, vector<1x8x128xf32>
    %59 = vector.shape_cast %58 : vector<1x8x128xf32> to vector<8x128xf32>
    %60 = vector.shape_cast %56 : vector<8x128xf32> to vector<1x8x128xf32>
    tpu.vector_store %arg7[%57, %c0_20, %c0_21], %60 {strides = array<i32>} : memref<8x8x128xf32, #tpu.memory_space<vmem>>, vector<1x8x128xf32>,
    %c2_i32 = arith.constant 2 : i32
    %61 = arith.index_cast %c2_i32 : i32 to index
    %c0_22 = arith.constant 0 : index
    %c0_23 = arith.constant 0 : index
    %62 = vector.load %arg2[%61, %c0_22, %c0_23] : memref<8x8x512xf32, #tpu.memory_space<vmem>>, vector<1x8x512xf32>
    %63 = vector.shape_cast %62 : vector<1x8x512xf32> to vector<8x512xf32>
    %64 = vector.extract_strided_slice %63 {offsets = [0, 0], sizes = [8, 384], strides = [1, 1]} : vector<8x512xf32> to vector<8x384xf32>
    %cst_24 = arith.constant dense<0.000000e+00> : vector<8x384xf32>
    %65 = tpu.matmul %56, %3, %cst_24 {dimension_numbers = #tpu.dot_dimension_numbers<[1], [0], [0], [1], [0, 0, 1, 1], [], []>} : vector<8x128xf32>, vector<128x384xf32>, vector<8x384xf32> -> vector<8x384xf32>
    %66 = arith.addf %64, %65 : vector<8x384xf32>
    %67 = vector.extract_strided_slice %63 {offsets = [0, 384], sizes = [8, 128], strides = [1, 1]} : vector<8x512xf32> to vector<8x128xf32>
    %cst_25 = arith.constant dense<0.000000e+00> : vector<8x128xf32>
    %68 = tpu.matmul %56, %4, %cst_25 {dimension_numbers = #tpu.dot_dimension_numbers<[1], [0], [0], [1], [0, 0, 1, 1], [], []>} : vector<8x128xf32>, vector<128x128xf32>, vector<8x128xf32> -> vector<8x128xf32>
    %69 = arith.addf %67, %68 : vector<8x128xf32>
    %70 = arith.negf %66 : vector<8x384xf32>
    %71 = math.exp %70 : vector<8x384xf32>
    %cst_26 = arith.constant 1.000000e+00 : f32
    %72 = vector.broadcast %cst_26 : f32 to vector<8x384xf32>
    %73 = arith.addf %72, %71 : vector<8x384xf32>
    %74 = arith.divf %72, %73 : vector<8x384xf32>
    %75 = vector.extract_strided_slice %74 {offsets = [0, 0], sizes = [8, 128], strides = [1, 1]} : vector<8x384xf32> to vector<8x128xf32>
    %76 = vector.extract_strided_slice %74 {offsets = [0, 128], sizes = [8, 128], strides = [1, 1]} : vector<8x384xf32> to vector<8x128xf32>
    %77 = vector.extract_strided_slice %74 {offsets = [0, 256], sizes = [8, 128], strides = [1, 1]} : vector<8x384xf32> to vector<8x128xf32>
    %78 = math.tanh %69 : vector<8x128xf32>
    %79 = arith.mulf %54, %76 : vector<8x128xf32>
    %80 = arith.mulf %75, %78 : vector<8x128xf32>
    %81 = arith.addf %79, %80 : vector<8x128xf32>
    %82 = math.tanh %81 : vector<8x128xf32>
    %83 = arith.mulf %77, %82 : vector<8x128xf32>
    %84 = arith.index_cast %c2_i32 : i32 to index
    %c0_27 = arith.constant 0 : index
    %c0_28 = arith.constant 0 : index
    %85 = vector.load %arg7[%84, %c0_27, %c0_28] : memref<8x8x128xf32, #tpu.memory_space<vmem>>, vector<1x8x128xf32>
    %86 = vector.shape_cast %85 : vector<1x8x128xf32> to vector<8x128xf32>
    %87 = vector.shape_cast %83 : vector<8x128xf32> to vector<1x8x128xf32>
    tpu.vector_store %arg7[%84, %c0_27, %c0_28], %87 {strides = array<i32>} : memref<8x8x128xf32, #tpu.memory_space<vmem>>, vector<1x8x128xf32>,
    %c3_i32 = arith.constant 3 : i32
    %88 = arith.index_cast %c3_i32 : i32 to index
    %c0_29 = arith.constant 0 : index
    %c0_30 = arith.constant 0 : index
    %89 = vector.load %arg2[%88, %c0_29, %c0_30] : memref<8x8x512xf32, #tpu.memory_space<vmem>>, vector<1x8x512xf32>
    %90 = vector.shape_cast %89 : vector<1x8x512xf32> to vector<8x512xf32>
    %91 = vector.extract_strided_slice %90 {offsets = [0, 0], sizes = [8, 384], strides = [1, 1]} : vector<8x512xf32> to vector<8x384xf32>
    %cst_31 = arith.constant dense<0.000000e+00> : vector<8x384xf32>
    %92 = tpu.matmul %83, %3, %cst_31 {dimension_numbers = #tpu.dot_dimension_numbers<[1], [0], [0], [1], [0, 0, 1, 1], [], []>} : vector<8x128xf32>, vector<128x384xf32>, vector<8x384xf32> -> vector<8x384xf32>
    %93 = arith.addf %91, %92 : vector<8x384xf32>
    %94 = vector.extract_strided_slice %90 {offsets = [0, 384], sizes = [8, 128], strides = [1, 1]} : vector<8x512xf32> to vector<8x128xf32>
    %cst_32 = arith.constant dense<0.000000e+00> : vector<8x128xf32>
    %95 = tpu.matmul %83, %4, %cst_32 {dimension_numbers = #tpu.dot_dimension_numbers<[1], [0], [0], [1], [0, 0, 1, 1], [], []>} : vector<8x128xf32>, vector<128x128xf32>, vector<8x128xf32> -> vector<8x128xf32>
    %96 = arith.addf %94, %95 : vector<8x128xf32>
    %97 = arith.negf %93 : vector<8x384xf32>
    %98 = math.exp %97 : vector<8x384xf32>
    %cst_33 = arith.constant 1.000000e+00 : f32
    %99 = vector.broadcast %cst_33 : f32 to vector<8x384xf32>
    %100 = arith.addf %99, %98 : vector<8x384xf32>
    %101 = arith.divf %99, %100 : vector<8x384xf32>
    %102 = vector.extract_strided_slice %101 {offsets = [0, 0], sizes = [8, 128], strides = [1, 1]} : vector<8x384xf32> to vector<8x128xf32>
    %103 = vector.extract_strided_slice %101 {offsets = [0, 128], sizes = [8, 128], strides = [1, 1]} : vector<8x384xf32> to vector<8x128xf32>
    %104 = vector.extract_strided_slice %101 {offsets = [0, 256], sizes = [8, 128], strides = [1, 1]} : vector<8x384xf32> to vector<8x128xf32>
    %105 = math.tanh %96 : vector<8x128xf32>
    %106 = arith.mulf %81, %103 : vector<8x128xf32>
    %107 = arith.mulf %102, %105 : vector<8x128xf32>
    %108 = arith.addf %106, %107 : vector<8x128xf32>
    %109 = math.tanh %108 : vector<8x128xf32>
    %110 = arith.mulf %104, %109 : vector<8x128xf32>
    %111 = arith.index_cast %c3_i32 : i32 to index
    %c0_34 = arith.constant 0 : index
    %c0_35 = arith.constant 0 : index
    %112 = vector.load %arg7[%111, %c0_34, %c0_35] : memref<8x8x128xf32, #tpu.memory_space<vmem>>, vector<1x8x128xf32>
    %113 = vector.shape_cast %112 : vector<1x8x128xf32> to vector<8x128xf32>
    %114 = vector.shape_cast %110 : vector<8x128xf32> to vector<1x8x128xf32>
    tpu.vector_store %arg7[%111, %c0_34, %c0_35], %114 {strides = array<i32>} : memref<8x8x128xf32, #tpu.memory_space<vmem>>, vector<1x8x128xf32>,
    %c4_i32 = arith.constant 4 : i32
    %115 = arith.index_cast %c4_i32 : i32 to index
    %c0_36 = arith.constant 0 : index
    %c0_37 = arith.constant 0 : index
    %116 = vector.load %arg2[%115, %c0_36, %c0_37] : memref<8x8x512xf32, #tpu.memory_space<vmem>>, vector<1x8x512xf32>
    %117 = vector.shape_cast %116 : vector<1x8x512xf32> to vector<8x512xf32>
    %118 = vector.extract_strided_slice %117 {offsets = [0, 0], sizes = [8, 384], strides = [1, 1]} : vector<8x512xf32> to vector<8x384xf32>
    %cst_38 = arith.constant dense<0.000000e+00> : vector<8x384xf32>
    %119 = tpu.matmul %110, %3, %cst_38 {dimension_numbers = #tpu.dot_dimension_numbers<[1], [0], [0], [1], [0, 0, 1, 1], [], []>} : vector<8x128xf32>, vector<128x384xf32>, vector<8x384xf32> -> vector<8x384xf32>
    %120 = arith.addf %118, %119 : vector<8x384xf32>
    %121 = vector.extract_strided_slice %117 {offsets = [0, 384], sizes = [8, 128], strides = [1, 1]} : vector<8x512xf32> to vector<8x128xf32>
    %cst_39 = arith.constant dense<0.000000e+00> : vector<8x128xf32>
    %122 = tpu.matmul %110, %4, %cst_39 {dimension_numbers = #tpu.dot_dimension_numbers<[1], [0], [0], [1], [0, 0, 1, 1], [], []>} : vector<8x128xf32>, vector<128x128xf32>, vector<8x128xf32> -> vector<8x128xf32>
    %123 = arith.addf %121, %122 : vector<8x128xf32>
    %124 = arith.negf %120 : vector<8x384xf32>
    %125 = math.exp %124 : vector<8x384xf32>
    %cst_40 = arith.constant 1.000000e+00 : f32
    %126 = vector.broadcast %cst_40 : f32 to vector<8x384xf32>
    %127 = arith.addf %126, %125 : vector<8x384xf32>
    %128 = arith.divf %126, %127 : vector<8x384xf32>
    %129 = vector.extract_strided_slice %128 {offsets = [0, 0], sizes = [8, 128], strides = [1, 1]} : vector<8x384xf32> to vector<8x128xf32>
    %130 = vector.extract_strided_slice %128 {offsets = [0, 128], sizes = [8, 128], strides = [1, 1]} : vector<8x384xf32> to vector<8x128xf32>
    %131 = vector.extract_strided_slice %128 {offsets = [0, 256], sizes = [8, 128], strides = [1, 1]} : vector<8x384xf32> to vector<8x128xf32>
    %132 = math.tanh %123 : vector<8x128xf32>
    %133 = arith.mulf %108, %130 : vector<8x128xf32>
    %134 = arith.mulf %129, %132 : vector<8x128xf32>
    %135 = arith.addf %133, %134 : vector<8x128xf32>
    %136 = math.tanh %135 : vector<8x128xf32>
    %137 = arith.mulf %131, %136 : vector<8x128xf32>
    %138 = arith.index_cast %c4_i32 : i32 to index
    %c0_41 = arith.constant 0 : index
    %c0_42 = arith.constant 0 : index
    %139 = vector.load %arg7[%138, %c0_41, %c0_42] : memref<8x8x128xf32, #tpu.memory_space<vmem>>, vector<1x8x128xf32>
    %140 = vector.shape_cast %139 : vector<1x8x128xf32> to vector<8x128xf32>
    %141 = vector.shape_cast %137 : vector<8x128xf32> to vector<1x8x128xf32>
    tpu.vector_store %arg7[%138, %c0_41, %c0_42], %141 {strides = array<i32>} : memref<8x8x128xf32, #tpu.memory_space<vmem>>, vector<1x8x128xf32>,
    %c5_i32 = arith.constant 5 : i32
    %142 = arith.index_cast %c5_i32 : i32 to index
    %c0_43 = arith.constant 0 : index
    %c0_44 = arith.constant 0 : index
    %143 = vector.load %arg2[%142, %c0_43, %c0_44] : memref<8x8x512xf32, #tpu.memory_space<vmem>>, vector<1x8x512xf32>
    %144 = vector.shape_cast %143 : vector<1x8x512xf32> to vector<8x512xf32>
    %145 = vector.extract_strided_slice %144 {offsets = [0, 0], sizes = [8, 384], strides = [1, 1]} : vector<8x512xf32> to vector<8x384xf32>
    %cst_45 = arith.constant dense<0.000000e+00> : vector<8x384xf32>
    %146 = tpu.matmul %137, %3, %cst_45 {dimension_numbers = #tpu.dot_dimension_numbers<[1], [0], [0], [1], [0, 0, 1, 1], [], []>} : vector<8x128xf32>, vector<128x384xf32>, vector<8x384xf32> -> vector<8x384xf32>
    %147 = arith.addf %145, %146 : vector<8x384xf32>
    %148 = vector.extract_strided_slice %144 {offsets = [0, 384], sizes = [8, 128], strides = [1, 1]} : vector<8x512xf32> to vector<8x128xf32>
    %cst_46 = arith.constant dense<0.000000e+00> : vector<8x128xf32>
    %149 = tpu.matmul %137, %4, %cst_46 {dimension_numbers = #tpu.dot_dimension_numbers<[1], [0], [0], [1], [0, 0, 1, 1], [], []>} : vector<8x128xf32>, vector<128x128xf32>, vector<8x128xf32> -> vector<8x128xf32>
    %150 = arith.addf %148, %149 : vector<8x128xf32>
    %151 = arith.negf %147 : vector<8x384xf32>
    %152 = math.exp %151 : vector<8x384xf32>
    %cst_47 = arith.constant 1.000000e+00 : f32
    %153 = vector.broadcast %cst_47 : f32 to vector<8x384xf32>
    %154 = arith.addf %153, %152 : vector<8x384xf32>
    %155 = arith.divf %153, %154 : vector<8x384xf32>
    %156 = vector.extract_strided_slice %155 {offsets = [0, 0], sizes = [8, 128], strides = [1, 1]} : vector<8x384xf32> to vector<8x128xf32>
    %157 = vector.extract_strided_slice %155 {offsets = [0, 128], sizes = [8, 128], strides = [1, 1]} : vector<8x384xf32> to vector<8x128xf32>
    %158 = vector.extract_strided_slice %155 {offsets = [0, 256], sizes = [8, 128], strides = [1, 1]} : vector<8x384xf32> to vector<8x128xf32>
    %159 = math.tanh %150 : vector<8x128xf32>
    %160 = arith.mulf %135, %157 : vector<8x128xf32>
    %161 = arith.mulf %156, %159 : vector<8x128xf32>
    %162 = arith.addf %160, %161 : vector<8x128xf32>
    %163 = math.tanh %162 : vector<8x128xf32>
    %164 = arith.mulf %158, %163 : vector<8x128xf32>
    %165 = arith.index_cast %c5_i32 : i32 to index
    %c0_48 = arith.constant 0 : index
    %c0_49 = arith.constant 0 : index
    %166 = vector.load %arg7[%165, %c0_48, %c0_49] : memref<8x8x128xf32, #tpu.memory_space<vmem>>, vector<1x8x128xf32>
    %167 = vector.shape_cast %166 : vector<1x8x128xf32> to vector<8x128xf32>
    %168 = vector.shape_cast %164 : vector<8x128xf32> to vector<1x8x128xf32>
    tpu.vector_store %arg7[%165, %c0_48, %c0_49], %168 {strides = array<i32>} : memref<8x8x128xf32, #tpu.memory_space<vmem>>, vector<1x8x128xf32>,
    %c6_i32 = arith.constant 6 : i32
    %169 = arith.index_cast %c6_i32 : i32 to index
    %c0_50 = arith.constant 0 : index
    %c0_51 = arith.constant 0 : index
    %170 = vector.load %arg2[%169, %c0_50, %c0_51] : memref<8x8x512xf32, #tpu.memory_space<vmem>>, vector<1x8x512xf32>
    %171 = vector.shape_cast %170 : vector<1x8x512xf32> to vector<8x512xf32>
    %172 = vector.extract_strided_slice %171 {offsets = [0, 0], sizes = [8, 384], strides = [1, 1]} : vector<8x512xf32> to vector<8x384xf32>
    %cst_52 = arith.constant dense<0.000000e+00> : vector<8x384xf32>
    %173 = tpu.matmul %164, %3, %cst_52 {dimension_numbers = #tpu.dot_dimension_numbers<[1], [0], [0], [1], [0, 0, 1, 1], [], []>} : vector<8x128xf32>, vector<128x384xf32>, vector<8x384xf32> -> vector<8x384xf32>
    %174 = arith.addf %172, %173 : vector<8x384xf32>
    %175 = vector.extract_strided_slice %171 {offsets = [0, 384], sizes = [8, 128], strides = [1, 1]} : vector<8x512xf32> to vector<8x128xf32>
    %cst_53 = arith.constant dense<0.000000e+00> : vector<8x128xf32>
    %176 = tpu.matmul %164, %4, %cst_53 {dimension_numbers = #tpu.dot_dimension_numbers<[1], [0], [0], [1], [0, 0, 1, 1], [], []>} : vector<8x128xf32>, vector<128x128xf32>, vector<8x128xf32> -> vector<8x128xf32>
    %177 = arith.addf %175, %176 : vector<8x128xf32>
    %178 = arith.negf %174 : vector<8x384xf32>
    %179 = math.exp %178 : vector<8x384xf32>
    %cst_54 = arith.constant 1.000000e+00 : f32
    %180 = vector.broadcast %cst_54 : f32 to vector<8x384xf32>
    %181 = arith.addf %180, %179 : vector<8x384xf32>
    %182 = arith.divf %180, %181 : vector<8x384xf32>
    %183 = vector.extract_strided_slice %182 {offsets = [0, 0], sizes = [8, 128], strides = [1, 1]} : vector<8x384xf32> to vector<8x128xf32>
    %184 = vector.extract_strided_slice %182 {offsets = [0, 128], sizes = [8, 128], strides = [1, 1]} : vector<8x384xf32> to vector<8x128xf32>
    %185 = vector.extract_strided_slice %182 {offsets = [0, 256], sizes = [8, 128], strides = [1, 1]} : vector<8x384xf32> to vector<8x128xf32>
    %186 = math.tanh %177 : vector<8x128xf32>
    %187 = arith.mulf %162, %184 : vector<8x128xf32>
    %188 = arith.mulf %183, %186 : vector<8x128xf32>
    %189 = arith.addf %187, %188 : vector<8x128xf32>
    %190 = math.tanh %189 : vector<8x128xf32>
    %191 = arith.mulf %185, %190 : vector<8x128xf32>
    %192 = arith.index_cast %c6_i32 : i32 to index
    %c0_55 = arith.constant 0 : index
    %c0_56 = arith.constant 0 : index
    %193 = vector.load %arg7[%192, %c0_55, %c0_56] : memref<8x8x128xf32, #tpu.memory_space<vmem>>, vector<1x8x128xf32>
    %194 = vector.shape_cast %193 : vector<1x8x128xf32> to vector<8x128xf32>
    %195 = vector.shape_cast %191 : vector<8x128xf32> to vector<1x8x128xf32>
    tpu.vector_store %arg7[%192, %c0_55, %c0_56], %195 {strides = array<i32>} : memref<8x8x128xf32, #tpu.memory_space<vmem>>, vector<1x8x128xf32>,
    %c7_i32 = arith.constant 7 : i32
    %196 = arith.index_cast %c7_i32 : i32 to index
    %c0_57 = arith.constant 0 : index
    %c0_58 = arith.constant 0 : index
    %197 = vector.load %arg2[%196, %c0_57, %c0_58] : memref<8x8x512xf32, #tpu.memory_space<vmem>>, vector<1x8x512xf32>
    %198 = vector.shape_cast %197 : vector<1x8x512xf32> to vector<8x512xf32>
    %199 = vector.extract_strided_slice %198 {offsets = [0, 0], sizes = [8, 384], strides = [1, 1]} : vector<8x512xf32> to vector<8x384xf32>
    %cst_59 = arith.constant dense<0.000000e+00> : vector<8x384xf32>
    %200 = tpu.matmul %191, %3, %cst_59 {dimension_numbers = #tpu.dot_dimension_numbers<[1], [0], [0], [1], [0, 0, 1, 1], [], []>} : vector<8x128xf32>, vector<128x384xf32>, vector<8x384xf32> -> vector<8x384xf32>
    %201 = arith.addf %199, %200 : vector<8x384xf32>
    %202 = vector.extract_strided_slice %198 {offsets = [0, 384], sizes = [8, 128], strides = [1, 1]} : vector<8x512xf32> to vector<8x128xf32>
    %cst_60 = arith.constant dense<0.000000e+00> : vector<8x128xf32>
    %203 = tpu.matmul %191, %4, %cst_60 {dimension_numbers = #tpu.dot_dimension_numbers<[1], [0], [0], [1], [0, 0, 1, 1], [], []>} : vector<8x128xf32>, vector<128x128xf32>, vector<8x128xf32> -> vector<8x128xf32>
    %204 = arith.addf %202, %203 : vector<8x128xf32>
    %205 = arith.negf %201 : vector<8x384xf32>
    %206 = math.exp %205 : vector<8x384xf32>
    %cst_61 = arith.constant 1.000000e+00 : f32
    %207 = vector.broadcast %cst_61 : f32 to vector<8x384xf32>
    %208 = arith.addf %207, %206 : vector<8x384xf32>
    %209 = arith.divf %207, %208 : vector<8x384xf32>
    %210 = vector.extract_strided_slice %209 {offsets = [0, 0], sizes = [8, 128], strides = [1, 1]} : vector<8x384xf32> to vector<8x128xf32>
    %211 = vector.extract_strided_slice %209 {offsets = [0, 128], sizes = [8, 128], strides = [1, 1]} : vector<8x384xf32> to vector<8x128xf32>
    %212 = vector.extract_strided_slice %209 {offsets = [0, 256], sizes = [8, 128], strides = [1, 1]} : vector<8x384xf32> to vector<8x128xf32>
    %213 = math.tanh %204 : vector<8x128xf32>
    %214 = arith.mulf %189, %211 : vector<8x128xf32>
    %215 = arith.mulf %210, %213 : vector<8x128xf32>
    %216 = arith.addf %214, %215 : vector<8x128xf32>
    %217 = math.tanh %216 : vector<8x128xf32>
    %218 = arith.mulf %212, %217 : vector<8x128xf32>
    %219 = arith.index_cast %c7_i32 : i32 to index
    %c0_62 = arith.constant 0 : index
    %c0_63 = arith.constant 0 : index
    %220 = vector.load %arg7[%219, %c0_62, %c0_63] : memref<8x8x128xf32, #tpu.memory_space<vmem>>, vector<1x8x128xf32>
    %221 = vector.shape_cast %220 : vector<1x8x128xf32> to vector<8x128xf32>
    %222 = vector.shape_cast %218 : vector<8x128xf32> to vector<1x8x128xf32>
    tpu.vector_store %arg7[%219, %c0_62, %c0_63], %222 {strides = array<i32>} : memref<8x8x128xf32, #tpu.memory_space<vmem>>, vector<1x8x128xf32>,
    %c8_i32 = arith.constant 8 : i32
    %c0_64 = arith.constant 0 : index
    %c0_65 = arith.constant 0 : index
    %223 = vector.load %arg8[%c0_64, %c0_65] : memref<8x128xf32, #tpu.memory_space<vmem>>, vector<8x128xf32>
    tpu.vector_store %arg8[%c0_64, %c0_65], %218 {strides = array<i32>} : memref<8x128xf32, #tpu.memory_space<vmem>>, vector<8x128xf32>,
    %c0_66 = arith.constant 0 : index
    %c0_67 = arith.constant 0 : index
    %224 = vector.load %arg9[%c0_66, %c0_67] : memref<8x128xf32, #tpu.memory_space<vmem>>, vector<8x128xf32>
    tpu.vector_store %arg9[%c0_66, %c0_67], %216 {strides = array<i32>} : memref<8x128xf32, #tpu.memory_space<vmem>>, vector<8x128xf32>,
    return
  }
  func.func @transform_0(%arg0: i32, %arg1: i32) -> (i32, i32, i32) {
    %c0_i32 = arith.constant 0 : i32
    %c0_i32_0 = arith.constant 0 : i32
    return %arg1, %arg0, %c0_i32 : i32, i32, i32
  }
  func.func @transform_1(%arg0: i32, %arg1: i32) -> (i32, i32) {
    %c0_i32 = arith.constant 0 : i32
    %c0_i32_0 = arith.constant 0 : i32
    %c0_i32_1 = arith.constant 0 : i32
    return %c0_i32, %c0_i32_0 : i32, i32
  }
  func.func @transform_2(%arg0: i32, %arg1: i32) -> (i32, i32) {
    %c0_i32 = arith.constant 0 : i32
    %c0_i32_0 = arith.constant 0 : i32
    %c0_i32_1 = arith.constant 0 : i32
    return %c0_i32, %c0_i32_0 : i32, i32
  }
  func.func @transform_3(%arg0: i32, %arg1: i32) -> (i32, i32) {
    %c0_i32 = arith.constant 0 : i32
    %c0_i32_0 = arith.constant 0 : i32
    return %arg0, %c0_i32 : i32, i32
  }
  func.func @transform_4(%arg0: i32, %arg1: i32) -> (i32, i32) {
    %c0_i32 = arith.constant 0 : i32
    %c0_i32_0 = arith.constant 0 : i32
    return %arg0, %c0_i32 : i32, i32
  }
  func.func @transform_5(%arg0: i32, %arg1: i32) -> (i32, i32, i32) {
    %c0_i32 = arith.constant 0 : i32
    %c0_i32_0 = arith.constant 0 : i32
    return %arg1, %arg0, %c0_i32 : i32, i32, i32
  }
}

</mosaic_0001>

<bundles_post_ra>
// kernel: tpu_custom_call.1
= control target key start
LH: loop header
LB: loop body
LE: loop exit
PB: predicated region body
PF: predicated region fallthrough
CT: control target
= control target key end

     0   :  { %10 = vsyncpa [#allocation5], 0  ;;  %s4521_s0 = inlined_call_operand.hbm [shape: f32[8,8,512], index: 0, kind: input, shape index: {}]   ;;  %s4522_s1 = inlined_call_operand.hbm [shape: f32[128,384], index: 1, kind: input, shape index: {}]   ;;  %s4523_s2 = inlined_call_operand.hbm [shape: f32[128,128], index: 2, kind: input, shape index: {}]   ;;  %s4524_s3 = inlined_call_operand.vmem [shape: f32[8,128], index: 3, kind: input, shape index: {}]   ;;  %s4525_s4 = inlined_call_operand.hbm [shape: f32[8,128], index: 4, kind: input, shape index: {}]   ;;  %s4526_s5 = inlined_call_operand.hbm [shape: f32[8,8,128], index: 5, kind: output, shape index: {}]  }
   0x1   :  { %11 = vsyncpa [#allocation8], 0 }
   0x2   :  { %12 = vsyncpa [#allocation11], 0 }
   0x3   :  { %13 = vsyncpa [#allocation6], 0  ;;  %s3891_s18 = smov [#allocation7]   ;;  %s3773_s22 = scalar_lea.hbm %s4522_s1, 6144 }
   0x4   :  { %s31_s19 = sshll.u32 %s3891_s18, 4  ;;  %p3774_p0 = scmp.ne.s32.totalorder %s4522_s1, %s3773_s22  ;;  %s32_s19 = int_to_ptr.vmem [resolvable:$true] %s31_s19 }
   0x5   :  { %p3777_p1 = scmp.lt.u32.totalorder %s3773_s22, %s4522_s1 }
   0x7   :  { %p3779_p2 = pnand %p3777_p1, %p3774_p0 }
   0x9   :  { %3782 = shalt.err (!%p3779_p2)
}
   0xa   :  { %s3783_s27 = scalar_lea.vmem %s32_s19, 6144  ;;  %p3788_p4 = scmp.lt.s32.totalorder %s32_s19, %s32_s19 }
   0xb   :  { %p3784_p3 = scmp.ne.s32.totalorder %s32_s19, %s3783_s27  ;;  %p3789_p5 = scmp.lt.s32.totalorder %s3783_s27, %s3783_s27 }
   0xd   :  { %p3790_p6 = por %p3789_p5, %p3788_p4 }
   0xf   :  { %p3791_p7 = pnand %p3790_p6, %p3784_p3 }
  0x11   :  { %3794 = shalt.err (!%p3791_p7)
}
  0x12   :  { %s3892_s28 = smov 384   ;;  %s3893_s29 = smov 24  }
  0x13   :  { %37 = dma.hbm_to_vmem [thread:$0]  %s4522_s1, 6144, %s32_s19, [#allocation8], %s3892_s28, %s3892_s28, %s3893_s29  }
  0x14   :  { %s3894_s7 = smov [#allocation4]   ;;  %s3795_s11 = scalar_lea.hbm %s4521_s0, 4096 }
  0x15   :  { %s19_s8 = sshll.u32 %s3894_s7, 4  ;;  %p3796_p8 = scmp.ne.s32.totalorder %s4521_s0, %s3795_s11  ;;  %s20_s8 = int_to_ptr.vmem [resolvable:$true] %s19_s8 }
  0x16   :  { %p3799_p9 = scmp.lt.u32.totalorder %s3795_s11, %s4521_s0 }
  0x18   :  { %p3801_p10 = pnand %p3799_p9, %p3796_p8 }
  0x1a   :  { %3804 = shalt.err (!%p3801_p10)
}
  0x1b   :  { %s3805_s16 = scalar_lea.vmem %s20_s8, 4096  ;;  %p3810_p12 = scmp.lt.s32.totalorder %s20_s8, %s20_s8 }
  0x1c   :  { %p3806_p11 = scmp.ne.s32.totalorder %s20_s8, %s3805_s16  ;;  %p3811_p13 = scmp.lt.s32.totalorder %s3805_s16, %s3805_s16 }
  0x1e   :  { %p3812_p0 = por %p3811_p13, %p3810_p12 }
  0x20   :  { %p3813_p1 = pnand %p3812_p0, %p3806_p11 }
  0x22   :  { %3816 = shalt.err (!%p3813_p1)
}
  0x23   :  { %s3895_s1 = smov 512   ;;  %s3896_s17 = smov 32  }
  0x24   :  { %25 = dma.hbm_to_vmem [thread:$0]  %s4521_s0, 4096, %s20_s8, [#allocation5], %s3895_s1, %s3895_s1, %s3896_s17  }
  0x25   :  { %s3897_s20 = smov [#allocation9]   ;;  %s3817_s24 = scalar_lea.hbm %s4523_s2, 2048 }
  0x26   :  { %s43_s21 = sshll.u32 %s3897_s20, 4  ;;  %p3818_p2 = scmp.ne.s32.totalorder %s4523_s2, %s3817_s24  ;;  %s44_s21 = int_to_ptr.vmem [resolvable:$true] %s43_s21 }
  0x27   :  { %p3821_p3 = scmp.lt.u32.totalorder %s3817_s24, %s4523_s2 }
  0x29   :  { %p3823_p4 = pnand %p3821_p3, %p3818_p2 }
  0x2b   :  { %3826 = shalt.err (!%p3823_p4)
}
  0x2c   :  { %s3827_s29 = scalar_lea.vmem %s44_s21, 2048  ;;  %p3832_p6 = scmp.lt.s32.totalorder %s44_s21, %s44_s21 }
  0x2d   :  { %p3828_p5 = scmp.ne.s32.totalorder %s44_s21, %s3827_s29  ;;  %p3833_p7 = scmp.lt.s32.totalorder %s3827_s29, %s3827_s29 }
  0x2f   :  { %p3834_p8 = por %p3833_p7, %p3832_p6 }
  0x31   :  { %p3835_p9 = pnand %p3834_p8, %p3828_p5 }
  0x33   :  { %3838 = shalt.err (!%p3835_p9)
}
  0x34   :  { %s3898_s0 = smov 128   ;;  %s3899_s30 = smov 8  }
  0x35   :  { %49 = dma.hbm_to_vmem [thread:$0]  %s4523_s2, 2048, %s44_s21, [#allocation8], %s3898_s0, %s3898_s0, %s3899_s30  }
  0x36   :  { %s3900_s8 = smov [#allocation10]   ;;  %s3839_s12 = scalar_lea.hbm %s4525_s4, 128 }
  0x37   :  { %s58_s9 = sshll.u32 %s3900_s8, 4  ;;  %p3840_p10 = scmp.ne.s32.totalorder %s4525_s4, %s3839_s12  ;;  %s59_s9 = int_to_ptr.vmem [resolvable:$true] %s58_s9 }
  0x38   :  { %p3843_p11 = scmp.lt.u32.totalorder %s3839_s12, %s4525_s4 }
  0x3a   :  { %p3845_p12 = pnand %p3843_p11, %p3840_p10 }
  0x3c   :  { %3848 = shalt.err (!%p3845_p12)
}
  0x3d   :  { %s3849_s1 = scalar_lea.vmem %s59_s9, 128  ;;  %p3854_p0 = scmp.lt.s32.totalorder %s59_s9, %s59_s9 }
  0x3e   :  { %p3850_p13 = scmp.ne.s32.totalorder %s59_s9, %s3849_s1  ;;  %p3855_p1 = scmp.lt.s32.totalorder %s3849_s1, %s3849_s1 }
  0x40   :  { %p3856_p2 = por %p3855_p1, %p3854_p0 }
  0x42   :  { %p3857_p3 = pnand %p3856_p2, %p3850_p13 }
  0x44   :  { %3860 = shalt.err (!%p3857_p3)
}
  0x45   :  { %61 = dma.hbm_to_vmem [thread:$0]  %s4525_s4, 128, %s59_s9, [#allocation11]  }
  0x46   :  { %3883 = dma.done.wait [#allocation5], 4096  }
  0x47   :  { %3884 = vsyncadd [#allocation5], 4294963200 }
  0x48   :  { %3885 = dma.done.wait [#allocation8], 8192  }
  0x49   :  { %3886 = vsyncadd [#allocation8], 4294959104 }
  0x4a   :  { %3887 = dma.done.wait [#allocation11], 128  }
  0x4b   :  { %3888 = vsyncadd [#allocation11], 4294967168  ;;  %v3901_v0 = vmov 0.0   ;;  %v3902_v1 = vmov 0.0|0.0   ;;  %vm3903_vm0 = vmmov 0   ;;  %v83_v2 = vld [vmem:[#allocation7 + $0x8] sm:$0xff] }
  0x4c   :  { %216 = vmatprep.mubr.f32.mxu0 %v3901_v0  ;;  %3023 = vmatprep.subr.bf16.mxu1 %v3902_v1  ;;  %v86_v3 = vld [vmem:[#allocation7 + $0x20] sm:$0xff]  ;;  %v85_v6 = vld [vmem:[#allocation7 + $0x18] sm:$0xff]  ;;  %v92_v8 = vld [vmem:[#allocation7 + $0x50] sm:$0xff] }
  0x4d   :  { %2463 = vmatprep.mubr.msk.f32.mxu1 %vm3903_vm0, %v3901_v0  ;;  %v82_v4 = vld [vmem:[#allocation7] sm:$0xff]  ;;  %v3990_v5 = vpack.c.bf16 %v86_v3, %v83_v2  ;;  %v89_v7 = vld [vmem:[#allocation7 + $0x38] sm:$0xff]  ;;  %v88_v11 = vld [vmem:[#allocation7 + $0x30] sm:$0xff] }
  0x4e   :  { %v3992_v9 = vpack.c.bf16 %v85_v6, %v82_v4  ;;  %v3994_v10 = vpack.c.bf16 %v92_v8, %v89_v7  ;;  %v91_v12 = vld [vmem:[#allocation7 + $0x48] sm:$0xff]  ;;  %v98_v14 = vld [vmem:[#allocation7 + $0x80] sm:$0xff]  ;;  %v97_v18 = vld [vmem:[#allocation7 + $0x78] sm:$0xff] }
  0x4f   :  { %v95_v13 = vld [vmem:[#allocation7 + $0x68] sm:$0xff]  ;;  %2992 = vmatprep.subr.bf16.mxu0 %v3990_v5  ;;  %v3998_v15 = vpack.c.bf16 %v91_v12, %v88_v11  ;;  %v94_v17 = vld [vmem:[#allocation7 + $0x60] sm:$0xff]  ;;  %v101_v19 = vld [vmem:[#allocation7 + $0x98] sm:$0xff] }
  0x50   :  { %2994 = vmatpush1.bf16.msra.mxu0 %v3992_v9  ;;  %v4001_v16 = vpack.c.bf16 %v98_v14, %v95_v13  ;;  %v104_v20 = vld [vmem:[#allocation7 + $0xb0] sm:$0xff]  ;;  %v4004_v21 = vpack.c.bf16 %v97_v18, %v94_v17  ;;  %v103_v24 = vld [vmem:[#allocation7 + $0xa8] sm:$0xff]  ;;  %v110_v26 = vld [vmem:[#allocation7 + $0xe0] sm:$0xff] }
  0x51   :  { %2996 = vmatprep.subr.bf16.mxu0 %v3994_v10  ;;  %v4007_v22 = vpack.c.bf16 %v104_v20, %v101_v19  ;;  %v100_v23 = vld [vmem:[#allocation7 + $0x90] sm:$0xff]  ;;  %v107_v25 = vld [vmem:[#allocation7 + $0xc8] sm:$0xff]  ;;  %v90_v31 = vld [vmem:[#allocation7 + $0x40] sm:$0xff] }
  0x52   :  { %v84_v27 = vld [vmem:[#allocation7 + $0x10] sm:$0xff]  ;;  %v87_v28 = vld [vmem:[#allocation7 + $0x28] sm:$0xff]  ;;  %v4010_v29 = vpack.c.bf16 %v103_v24, %v100_v23  ;;  %v93_v32 = vld [vmem:[#allocation7 + $0x58] sm:$0xff]  ;;  %v4015_v33 = vpack.c.bf16 %v110_v26, %v107_v25 }
  0x53   :  { %v4012_v30 = vpack.c.bf16 %v87_v28, %v84_v27  ;;  %v106_v34 = vld [vmem:[#allocation7 + $0xc0] sm:$0xff]  ;;  %v109_v35 = vld [vmem:[#allocation7 + $0xd8] sm:$0xff]  ;;  %v116_v37 = vld [vmem:[#allocation7 + $0x110] sm:$0xff]  ;;  %v4018_v38 = vpack.c.bf16 %v93_v32, %v90_v31 }
  0x54   :  { %2998 = vmatpush1.bf16.msra.mxu0 %v3998_v15  ;;  %v113_v36 = vld [vmem:[#allocation7 + $0xf8] sm:$0xff]  ;;  %v96_v39 = vld [vmem:[#allocation7 + $0x70] sm:$0xff]  ;;  %v99_v40 = vld [vmem:[#allocation7 + $0x88] sm:$0xff]  ;;  %v4022_v41 = vpack.c.bf16 %v109_v35, %v106_v34 }
  0x55   :  { %3000 = vmatprep.subr.bf16.mxu0 %v4001_v16  ;;  %3025 = vmatpush3.bf16.msra.mxu1 %v4012_v30  ;;  %v4025_v42 = vpack.c.bf16 %v116_v37, %v113_v36  ;;  %v112_v43 = vld [vmem:[#allocation7 + $0xf0] sm:$0xff]  ;;  %v115_v44 = vld [vmem:[#allocation7 + $0x108] sm:$0xff]  ;;  %v122_v46 = vld [vmem:[#allocation7 + $0x140] sm:$0xff]  ;;  %v4028_v47 = vpack.c.bf16 %v99_v40, %v96_v39 }
  0x56   :  { %3026 = vmatprep.subr.bf16.mxu1 %v3902_v1  ;;  %v119_v45 = vld [vmem:[#allocation7 + $0x128] sm:$0xff]  ;;  %v102_v48 = vld [vmem:[#allocation7 + $0xa0] sm:$0xff]  ;;  %v105_v49 = vld [vmem:[#allocation7 + $0xb8] sm:$0xff]  ;;  %v4032_v50 = vpack.c.bf16 %v115_v44, %v112_v43 }
  0x57   :  { %v4035_v51 = vpack.c.bf16 %v122_v46, %v119_v45  ;;  %v118_v52 = vld [vmem:[#allocation7 + $0x120] sm:$0xff]  ;;  %v121_v53 = vld [vmem:[#allocation7 + $0x138] sm:$0xff]  ;;  %v128_v55 = vld [vmem:[#allocation7 + $0x170] sm:$0xff]  ;;  %v4038_v56 = vpack.c.bf16 %v105_v49, %v102_v48 }
  0x58   :  { %3002 = vmatpush1.bf16.msra.mxu0 %v4004_v21  ;;  %v125_v54 = vld [vmem:[#allocation7 + $0x158] sm:$0xff]  ;;  %v108_v57 = vld [vmem:[#allocation7 + $0xd0] sm:$0xff]  ;;  %v111_v58 = vld [vmem:[#allocation7 + $0xe8] sm:$0xff]  ;;  %v4042_v59 = vpack.c.bf16 %v121_v53, %v118_v52 }
  0x59   :  { %3004 = vmatprep.subr.bf16.mxu0 %v4007_v22  ;;  %3028 = vmatpush3.bf16.msra.mxu1 %v4018_v38  ;;  %v4045_v60 = vpack.c.bf16 %v128_v55, %v125_v54  ;;  %v124_v61 = vld [vmem:[#allocation7 + $0x150] sm:$0xff]  ;;  %v127_v62 = vld [vmem:[#allocation7 + $0x168] sm:$0xff]  ;;  %v4048_v63 = vpack.c.bf16 %v111_v58, %v108_v57  ;;  %v114_v2 = vld [vmem:[#allocation7 + $0x100] sm:$0xff] }
  0x5a   :  { %3029 = vmatprep.subr.bf16.mxu1 %v3902_v1  ;;  %v117_v3 = vld [vmem:[#allocation7 + $0x118] sm:$0xff]  ;;  %v4052_v4 = vpack.c.bf16 %v127_v62, %v124_v61  ;;  %v130_v6 = vld [vmem:[#allocation9] sm:$0xff]  ;;  %v131_v7 = vld [vmem:[#allocation9 + $0x8] sm:$0xff] }
  0x5b   :  { %v4056_v8 = vpack.c.bf16 %v117_v3, %v114_v2  ;;  %v120_v11 = vld [vmem:[#allocation7 + $0x130] sm:$0xff]  ;;  %v123_v12 = vld [vmem:[#allocation7 + $0x148] sm:$0xff]  ;;  %v4063_v13 = vld [vmem:[%s4524_s3] sm:$0xff]  ;;  %v4065_v14 = vpack.c.bf16 %v131_v7, %v130_v6  ;;  %s3904_s3 = smov [#allocation12]  }
  0x5c   :  { %3006 = vmatpush1.bf16.msra.mxu0 %v4010_v29  ;;  %v132_v17 = vld [vmem:[#allocation9 + $0x10] sm:$0xff]  ;;  %v133_v18 = vld [vmem:[#allocation9 + $0x18] sm:$0xff]  ;;  %v4069_v19 = vpack.c.bf16 %v123_v12, %v120_v11  ;;  %v126_v20 = vld [vmem:[#allocation7 + $0x160] sm:$0xff]  ;;  %s2121_s19 = sshll.u32 %s3904_s3, 4  ;;  %s2122_s19 = int_to_ptr.vmem [resolvable:$true] %s2121_s19 }
  0x5d   :  { %3008 = vmatprep.subr.bf16.mxu0 %v4015_v33  ;;  %3031 = vmatpush3.bf16.msra.mxu1 %v4028_v47  ;;  %v129_v23 = vld [vmem:[#allocation7 + $0x178] sm:$0xff]  ;;  %v4074_v24 = vpack.c.bf16 %v133_v18, %v132_v17  ;;  %v134_v25 = vld [vmem:[#allocation9 + $0x20] sm:$0xff]  ;;  %v135_v26 = vld [vmem:[#allocation9 + $0x28] sm:$0xff]  ;;  %s3861_s20 = scalar_lea.vmem %s2122_s19, 1024  ;;  %p3866_p5 = scmp.lt.s32.totalorder %s2122_s19, %s2122_s19 }
  0x5e   :  { %3032 = vmatprep.subr.bf16.mxu1 %v3902_v1  ;;  %v4080_v27 = vpack.c.bf16 %v129_v23, %v126_v20  ;;  %v4084_v28 = vpack.c.bf16 %v135_v26, %v134_v25  ;;  %v136_v31 = vld [vmem:[#allocation9 + $0x30] sm:$0xff]  ;;  %v137_v32 = vld [vmem:[#allocation9 + $0x38] sm:$0xff]  ;;  %v138_v35 = vld [vmem:[#allocation9 + $0x40] sm:$0xff]  ;;  %p3862_p4 = scmp.ne.s32.totalorder %s2122_s19, %s3861_s20  ;;  %p3867_p6 = scmp.lt.s32.totalorder %s3861_s20, %s3861_s20 }
  0x5f   :  { %v4090_v34 = vpack.c.bf16 %v137_v32, %v136_v31  ;;  %v139_v36 = vld [vmem:[#allocation9 + $0x48] sm:$0xff]  ;;  %v140_v39 = vld [vmem:[#allocation9 + $0x50] sm:$0xff]  ;;  %v141_v40 = vld [vmem:[#allocation9 + $0x58] sm:$0xff] }
  0x60   :  { %3010 = vmatpush1.bf16.msra.mxu0 %v4022_v41  ;;  %v4098_v37 = vpack.c.bf16 %v139_v36, %v138_v35  ;;  %v4104_v43 = vpack.c.bf16 %v141_v40, %v140_v39  ;;  %v142_v44 = vld [vmem:[#allocation9 + $0x60] sm:$0xff]  ;;  %v143_v45 = vld [vmem:[#allocation9 + $0x68] sm:$0xff]  ;;  %v144_v48 = vld [vmem:[#allocation9 + $0x70] sm:$0xff]  ;;  %p3868_p7 = por %p3867_p6, %p3866_p5 }
  0x61   :  { %3012 = vmatprep.subr.bf16.mxu0 %v4025_v42  ;;  %3034 = vmatpush3.bf16.msra.mxu1 %v4038_v56  ;;  %v4110_v46 = vpack.c.bf16 %v143_v45, %v142_v44  ;;  %v145_v49 = vld [vmem:[#allocation9 + $0x78] sm:$0xff]  ;;  %v149_v55 = vld [vmem:[#allocation4 + $0x8] sm:$0xff]  ;;  %v148_v57 = vld [vmem:[#allocation4] sm:$0xff] }
  0x62   :  { %3035 = vmatprep.subr.bf16.mxu1 %v3902_v1  ;;  %v4116_v52 = vpack.c.bf16 %v145_v49, %v144_v48  ;;  %v150_v7 = vld [vmem:[#allocation4 + $0x10] sm:$0xff]  ;;  %v151_v23 = vld [vmem:[#allocation4 + $0x18] sm:$0xff]  ;;  %v80_v36 = vld [vmem:[#allocation10] sm:$0xff]  ;;  %p3869_p8 = pnand %p3868_p7, %p3862_p4 }
  0x64   :  { %3014 = vmatpush1.bf16.msra.mxu0 %v4032_v50 }
  0x65   :  { %3016 = vmatprep.subr.bf16.mxu0 %v4035_v51  ;;  %3037 = vmatpush3.bf16.msra.mxu1 %v4048_v63 }
  0x66   :  { %3038 = vmatprep.subr.bf16.mxu1 %v3902_v1 }
  0x68   :  { %3018 = vmatpush1.bf16.msra.mxu0 %v4042_v59 }
  0x69   :  { %3020 = vmatprep.subr.bf16.mxu0 %v4045_v60  ;;  %3040 = vmatpush3.bf16.msra.mxu1 %v4056_v8 }
  0x6a   :  { %3041 = vmatprep.subr.bf16.mxu1 %v3902_v1 }
  0x6c   :  { %3022 = vmatpush1.bf16.msra.mxu0 %v4052_v4 }
  0x6d   :  { %3047 = vmatprep.subr.bf16.mxu0 %v3902_v1  ;;  %3043 = vmatpush3.bf16.msra.mxu1 %v4069_v19 }
  0x6e   :  { %3044 = vmatprep.subr.bf16.mxu1 %v3902_v1 }
  0x6f   :  { %217 = vmatmul.mubr.f32.vlgmr.msra.gmra.mrb[0].mxu0 %v4063_v13 }
  0x70   :  { %3049 = vmatpush3.bf16.msra.mxu0 %v4065_v14  ;;  %2498 = vmatprep.mubr.msk.f32.mxu0 %vm3903_vm0, %v3901_v0 }
  0x71   :  { %3050 = vmatprep.subr.bf16.mxu0 %v3902_v1  ;;  %3046 = vmatpush3.bf16.msra.mxu1 %v4080_v27 }
  0x72   :  { %3072 = vmatprep.subr.bf16.mxu1 %v3990_v5 }
  0x74   :  { %3052 = vmatpush3.bf16.msra.mxu0 %v4074_v24  ;;  %2464 = vmatmul.mubr.f32.vlgmr.msra.gmra.mrb[0].mxu1 %v4063_v13 }
  0x75   :  { %3053 = vmatprep.subr.bf16.mxu0 %v3902_v1  ;;  %3074 = vmatpush1.bf16.msra.mxu1 %v3992_v9 }
  0x76   :  { %461 = vmatprep.mubr.f32.mxu1 %v3901_v0  ;;  %3076 = vmatprep.subr.bf16.mxu1 %v3994_v10 }
  0x78   :  { %3055 = vmatpush3.bf16.msra.mxu0 %v4084_v28 }
  0x79   :  { %3056 = vmatprep.subr.bf16.mxu0 %v3902_v1  ;;  %3078 = vmatpush1.bf16.msra.mxu1 %v3998_v15 }
  0x7a   :  { %3080 = vmatprep.subr.bf16.mxu1 %v4001_v16 }
  0x7c   :  { %3058 = vmatpush3.bf16.msra.mxu0 %v4090_v34 }
  0x7d   :  { %3059 = vmatprep.subr.bf16.mxu0 %v3902_v1  ;;  %3082 = vmatpush1.bf16.msra.mxu1 %v4004_v21 }
  0x7e   :  { %3084 = vmatprep.subr.bf16.mxu1 %v4007_v22 }
  0x80   :  { %3061 = vmatpush3.bf16.msra.mxu0 %v4098_v37 }
  0x81   :  { %3062 = vmatprep.subr.bf16.mxu0 %v3902_v1  ;;  %3086 = vmatpush1.bf16.msra.mxu1 %v4010_v29 }
  0x82   :  { %3088 = vmatprep.subr.bf16.mxu1 %v4015_v33 }
  0x84   :  { %3064 = vmatpush3.bf16.msra.mxu0 %v4104_v43 }
  0x85   :  { %3065 = vmatprep.subr.bf16.mxu0 %v3902_v1  ;;  %3090 = vmatpush1.bf16.msra.mxu1 %v4022_v41 }
  0x86   :  { %3092 = vmatprep.subr.bf16.mxu1 %v4025_v42 }
  0x88   :  { %3067 = vmatpush3.bf16.msra.mxu0 %v4110_v46 }
  0x89   :  { %3068 = vmatprep.subr.bf16.mxu0 %v3902_v1  ;;  %3094 = vmatpush1.bf16.msra.mxu1 %v4032_v50 }
  0x8a   :  { %3096 = vmatprep.subr.bf16.mxu1 %v4035_v51 }
  0x8c   :  { %3070 = vmatpush3.bf16.msra.mxu0 %v4116_v52 }
  0x8d   :  { %3103 = vmatprep.subr.bf16.mxu0 %v3902_v1  ;;  %3098 = vmatpush1.bf16.msra.mxu1 %v4042_v59 }
  0x8e   :  { %3100 = vmatprep.subr.bf16.mxu1 %v4045_v60 }
  0x8f   :  { %2499 = vmatmul.mubr.f32.vlgmr.msra.gmra.mrb[2].mxu0 %v4063_v13 }
  0x90   :  { %3105 = vmatpush3.bf16.msra.mxu0 %v4012_v30  ;;  %2533 = vmatprep.mubr.msk.f32.mxu0 %vm3903_vm0, %v3901_v0 }
  0x91   :  { %3106 = vmatprep.subr.bf16.mxu0 %v3902_v1  ;;  %3102 = vmatpush1.bf16.msra.mxu1 %v4052_v4 }
  0x92   :  { %3127 = vmatprep.subr.bf16.mxu1 %v3902_v1 }
  0x94   :  { %3108 = vmatpush3.bf16.msra.mxu0 %v4018_v38 }
  0x95   :  { %3109 = vmatprep.subr.bf16.mxu0 %v3902_v1 }
  0x98   :  { %3111 = vmatpush3.bf16.msra.mxu0 %v4028_v47 }
  0x99   :  { %3112 = vmatprep.subr.bf16.mxu0 %v3902_v1 }
  0x9c   :  { %3114 = vmatpush3.bf16.msra.mxu0 %v4038_v56 }
  0x9d   :  { %3115 = vmatprep.subr.bf16.mxu0 %v3902_v1 }
  0xa0   :  { %3117 = vmatpush3.bf16.msra.mxu0 %v4048_v63 }
  0xa1   :  { %3118 = vmatprep.subr.bf16.mxu0 %v3902_v1 }
  0xa4   :  { %3120 = vmatpush3.bf16.msra.mxu0 %v4056_v8 }
  0xa5   :  { %3121 = vmatprep.subr.bf16.mxu0 %v3902_v1 }
  0xa8   :  { %3123 = vmatpush3.bf16.msra.mxu0 %v4069_v19 }
  0xa9   :  { %3124 = vmatprep.subr.bf16.mxu0 %v3902_v1 }
  0xac   :  { %3126 = vmatpush3.bf16.msra.mxu0 %v4080_v27 }
  0xad   :  { %3152 = vmatprep.subr.bf16.mxu0 %v3990_v5 }
 0x142   :  { %v218_v53 = vpop.f32.mrb[0].mxu0 }
 0x143   :  { %v220_v54 = vpop.f32.mrb[1].mxu0  ;;  %v293_v61 = vadd.f32 %v218_v53, %v148_v57 }
 0x144   :  { %v294_v58 = vadd.f32 %v220_v54, %v149_v55 }
 0x145   :  { %v2135_v6 = vmul.f32 -1.442695, %v293_v61 }
 0x146   :  { %v2136_v3 = vmul.f32 -1.442695, %v294_v58 }
 0x147   :  { %v289_v62 = vpop.f32.mrb[0].mxu1 }
 0x148   :  { %v2465_v2 = vpop.f32.mrb[1].mxu1  ;;  %3645 = vpow2.f32 %v2136_v3  ;;  %v295_v11 = vadd.f32 %v289_v62, %v150_v7  ;;  %v393_v3 = vld [vmem:[#allocation4 + $0x20] sm:$0xff] }
 0x149   :  { %3647 = vpow2.f32 %v2135_v6  ;;  %v394_v2 = vld [vmem:[#allocation4 + $0x28] sm:$0xff] }
 0x14a   :  { %v2137_v17 = vmul.f32 -1.442695, %v295_v11 }
 0x14c   :  { %3649 = vpow2.f32 %v2137_v17 }
 0x152   :  { %v3646_v12 = vpop.eup %3645 }
 0x153   :  { %v3648_v13 = vpop.eup %3647  ;;  %v377_v18 = vadd.f32 1.0, %v3646_v12 }
 0x154   :  { %v376_v20 = vadd.f32 1.0, %v3648_v13  ;;  %v395_v13 = vld [vmem:[#allocation4 + $0x30] sm:$0xff] }
 0x155   :  { %3651 = vrcp.f32 %v377_v18 }
 0x156   :  { %3653 = vrcp.f32 %v376_v20  ;;  %v3650_v32 = vpop.eup %3649 }
 0x157   :  { %v378_v40 = vadd.f32 1.0, %v3650_v32 }
 0x15f   :  { %v3652_v35 = vpop.eup %3651 }
 0x160   :  { %v3654_v39 = vpop.eup %3653  ;;  %v386_v45 = vmul.f32 %v3652_v35, %v80_v36 }
 0x162   :  { %v362_v25 = vpop.f32.mrb[2].mxu0 }
 0x163   :  { %v366_v26 = vadd.f32 %v362_v25, %v151_v23  ;;  %v2500_v31 = vpop.f32.mrb[3].mxu0 }
 0x164   :  { %v396_v31 = vld [vmem:[#allocation4 + $0x38] sm:$0xff] }
 0x165   :  { %3655 = vtanh.f32 %v366_v26 }
 0x166   :  { %3657 = vrcp.f32 %v378_v40 }
 0x16f   :  { %v3656_v44 = vpop.eup %3655 }
 0x170   :  { %v387_v48 = vmul.f32 %v3656_v44, %v3654_v39  ;;  %v3658_v53 = vpop.eup %3657 }
 0x172   :  { %v4148_v49 = vadd.f32 %v387_v48, %v386_v45 }
 0x174   :  { %3659 = vtanh.f32 %v4148_v49 }
 0x17e   :  { %v3660_v54 = vpop.eup %3659 }
 0x17f   :  { %v390_v55 = vmul.f32 %v3660_v54, %v3658_v53 }
 0x181   :  { %391 = vst [vmem:[#allocation12] sm:$0xff] %v390_v55  ;;  %462 = vmatmul.mubr.f32.vlgmr.msra.gmra.mrb[2].mxu1 %v390_v55  ;;  %2534 = vmatmul.mubr.f32.vlgmr.msra.gmra.mrb[4].mxu0 %v390_v55 }
 0x182   :  { %3129 = vmatpush3.bf16.msra.mxu1 %v4065_v14  ;;  %2568 = vmatprep.mubr.msk.f32.mxu1 %vm3903_vm0, %v3901_v0 }
 0x183   :  { %3130 = vmatprep.subr.bf16.mxu1 %v3902_v1  ;;  %3154 = vmatpush1.bf16.msra.mxu0 %v3992_v9 }
 0x184   :  { %3156 = vmatprep.subr.bf16.mxu0 %v3994_v10  ;;  %707 = vmatprep.mubr.f32.mxu0 %v3901_v0 }
 0x186   :  { %3132 = vmatpush3.bf16.msra.mxu1 %v4074_v24 }
 0x187   :  { %3133 = vmatprep.subr.bf16.mxu1 %v3902_v1  ;;  %3158 = vmatpush1.bf16.msra.mxu0 %v3998_v15 }
 0x188   :  { %3160 = vmatprep.subr.bf16.mxu0 %v4001_v16 }
 0x18a   :  { %3135 = vmatpush3.bf16.msra.mxu1 %v4084_v28 }
 0x18b   :  { %3136 = vmatprep.subr.bf16.mxu1 %v3902_v1  ;;  %3162 = vmatpush1.bf16.msra.mxu0 %v4004_v21 }
 0x18c   :  { %3164 = vmatprep.subr.bf16.mxu0 %v4007_v22 }
 0x18e   :  { %3138 = vmatpush3.bf16.msra.mxu1 %v4090_v34 }
 0x18f   :  { %3139 = vmatprep.subr.bf16.mxu1 %v3902_v1  ;;  %3166 = vmatpush1.bf16.msra.mxu0 %v4010_v29 }
 0x190   :  { %3168 = vmatprep.subr.bf16.mxu0 %v4015_v33 }
 0x192   :  { %3141 = vmatpush3.bf16.msra.mxu1 %v4098_v37 }
 0x193   :  { %3142 = vmatprep.subr.bf16.mxu1 %v3902_v1  ;;  %3170 = vmatpush1.bf16.msra.mxu0 %v4022_v41 }
 0x194   :  { %3172 = vmatprep.subr.bf16.mxu0 %v4025_v42 }
 0x196   :  { %3144 = vmatpush3.bf16.msra.mxu1 %v4104_v43 }
 0x197   :  { %3145 = vmatprep.subr.bf16.mxu1 %v3902_v1  ;;  %3174 = vmatpush1.bf16.msra.mxu0 %v4032_v50 }
 0x198   :  { %3176 = vmatprep.subr.bf16.mxu0 %v4035_v51 }
 0x19a   :  { %3147 = vmatpush3.bf16.msra.mxu1 %v4110_v46 }
 0x19b   :  { %3148 = vmatprep.subr.bf16.mxu1 %v3902_v1  ;;  %3178 = vmatpush1.bf16.msra.mxu0 %v4042_v59 }
 0x19c   :  { %3180 = vmatprep.subr.bf16.mxu0 %v4045_v60 }
 0x19e   :  { %3150 = vmatpush3.bf16.msra.mxu1 %v4116_v52 }
 0x19f   :  { %3183 = vmatprep.subr.bf16.mxu1 %v3902_v1  ;;  %3182 = vmatpush1.bf16.msra.mxu0 %v4052_v4 }
 0x1a0   :  { %3207 = vmatprep.subr.bf16.mxu0 %v3902_v1 }
 0x1a1   :  { %2569 = vmatmul.mubr.f32.vlgmr.msra.gmra.mrb[4].mxu1 %v390_v55 }
 0x1a2   :  { %3185 = vmatpush3.bf16.msra.mxu1 %v4012_v30  ;;  %2603 = vmatprep.mubr.msk.f32.mxu1 %vm3903_vm0, %v3901_v0 }
 0x1a3   :  { %3186 = vmatprep.subr.bf16.mxu1 %v3902_v1 }
 0x1a6   :  { %3188 = vmatpush3.bf16.msra.mxu1 %v4018_v38 }
 0x1a7   :  { %3189 = vmatprep.subr.bf16.mxu1 %v3902_v1 }
 0x1aa   :  { %3191 = vmatpush3.bf16.msra.mxu1 %v4028_v47 }
 0x1ab   :  { %3192 = vmatprep.subr.bf16.mxu1 %v3902_v1 }
 0x1ae   :  { %3194 = vmatpush3.bf16.msra.mxu1 %v4038_v56 }
 0x1af   :  { %3195 = vmatprep.subr.bf16.mxu1 %v3902_v1 }
 0x1b2   :  { %3197 = vmatpush3.bf16.msra.mxu1 %v4048_v63 }
 0x1b3   :  { %3198 = vmatprep.subr.bf16.mxu1 %v3902_v1 }
 0x1b6   :  { %3200 = vmatpush3.bf16.msra.mxu1 %v4056_v8 }
 0x1b7   :  { %3201 = vmatprep.subr.bf16.mxu1 %v3902_v1 }
 0x1ba   :  { %3203 = vmatpush3.bf16.msra.mxu1 %v4069_v19 }
 0x1bb   :  { %3204 = vmatprep.subr.bf16.mxu1 %v3902_v1 }
 0x1be   :  { %3206 = vmatpush3.bf16.msra.mxu1 %v4080_v27 }
 0x1bf   :  { %3232 = vmatprep.subr.bf16.mxu1 %v3990_v5 }
 0x254   :  { %v463_v57 = vpop.f32.mrb[2].mxu1  ;;  %v534_v58 = vpop.f32.mrb[4].mxu0 }
 0x255   :  { %v465_v61 = vpop.f32.mrb[3].mxu1  ;;  %v2535_v62 = vpop.f32.mrb[5].mxu0  ;;  %v538_v7 = vadd.f32 %v463_v57, %v393_v3  ;;  %v540_v17 = vadd.f32 %v534_v58, %v395_v13 }
 0x256   :  { %v539_v6 = vadd.f32 %v465_v61, %v394_v2 }
 0x257   :  { %v2138_v12 = vmul.f32 -1.442695, %v538_v7  ;;  %v2140_v23 = vmul.f32 -1.442695, %v540_v17  ;;  %v639_v7 = vld [vmem:[#allocation4 + $0x40] sm:$0xff] }
 0x258   :  { %v2139_v11 = vmul.f32 -1.442695, %v539_v6  ;;  %v640_v6 = vld [vmem:[#allocation4 + $0x48] sm:$0xff] }
 0x25a   :  { %3661 = vpow2.f32 %v2139_v11 }
 0x25b   :  { %3663 = vpow2.f32 %v2138_v12 }
 0x25c   :  { %3665 = vpow2.f32 %v2140_v23 }
 0x264   :  { %v3662_v18 = vpop.eup %3661 }
 0x265   :  { %v3664_v20 = vpop.eup %3663  ;;  %v622_v25 = vadd.f32 1.0, %v3662_v18  ;;  %v641_v18 = vld [vmem:[#allocation4 + $0x50] sm:$0xff] }
 0x266   :  { %v621_v26 = vadd.f32 1.0, %v3664_v20  ;;  %v3666_v39 = vpop.eup %3665 }
 0x267   :  { %3667 = vrcp.f32 %v622_v25  ;;  %v623_v48 = vadd.f32 1.0, %v3666_v39 }
 0x268   :  { %3669 = vrcp.f32 %v621_v26 }
 0x271   :  { %v3668_v40 = vpop.eup %3667 }
 0x272   :  { %v3670_v44 = vpop.eup %3669  ;;  %v631_v53 = vmul.f32 %v3668_v40, %v4148_v49 }
 0x274   :  { %v607_v32 = vpop.f32.mrb[4].mxu1 }
 0x275   :  { %v611_v35 = vadd.f32 %v607_v32, %v396_v31  ;;  %v2570_v36 = vpop.f32.mrb[5].mxu1 }
 0x277   :  { %3671 = vtanh.f32 %v611_v35  ;;  %v642_v35 = vld [vmem:[#allocation4 + $0x58] sm:$0xff] }
 0x278   :  { %3673 = vrcp.f32 %v623_v48 }
 0x281   :  { %v3672_v45 = vpop.eup %3671 }
 0x282   :  { %v632_v54 = vmul.f32 %v3672_v45, %v3670_v44  ;;  %v3674_v57 = vpop.eup %3673 }
 0x284   :  { %v4205_v55 = vadd.f32 %v632_v54, %v631_v53 }
 0x286   :  { %3675 = vtanh.f32 %v4205_v55 }
 0x290   :  { %v3676_v58 = vpop.eup %3675 }
 0x291   :  { %v635_v61 = vmul.f32 %v3676_v58, %v3674_v57 }
 0x293   :  { %637 = vst [vmem:[#allocation12 + $0x8] sm:$0xff] %v635_v61  ;;  %708 = vmatmul.mubr.f32.vlgmr.msra.gmra.mrb[6].mxu0 %v635_v61  ;;  %2604 = vmatmul.mubr.f32.vlgmr.msra.gmra.mrb[6].mxu1 %v635_v61 }
 0x294   :  { %3209 = vmatpush3.bf16.msra.mxu0 %v4065_v14  ;;  %2638 = vmatprep.mubr.msk.f32.mxu0 %vm3903_vm0, %v3901_v0 }
 0x295   :  { %3210 = vmatprep.subr.bf16.mxu0 %v3902_v1  ;;  %3234 = vmatpush1.bf16.msra.mxu1 %v3992_v9 }
 0x296   :  { %3236 = vmatprep.subr.bf16.mxu1 %v3994_v10  ;;  %953 = vmatprep.mubr.f32.mxu1 %v3901_v0 }
 0x298   :  { %3212 = vmatpush3.bf16.msra.mxu0 %v4074_v24 }
 0x299   :  { %3213 = vmatprep.subr.bf16.mxu0 %v3902_v1  ;;  %3238 = vmatpush1.bf16.msra.mxu1 %v3998_v15 }
 0x29a   :  { %3240 = vmatprep.subr.bf16.mxu1 %v4001_v16 }
 0x29c   :  { %3215 = vmatpush3.bf16.msra.mxu0 %v4084_v28 }
 0x29d   :  { %3216 = vmatprep.subr.bf16.mxu0 %v3902_v1  ;;  %3242 = vmatpush1.bf16.msra.mxu1 %v4004_v21 }
 0x29e   :  { %3244 = vmatprep.subr.bf16.mxu1 %v4007_v22 }
 0x2a0   :  { %3218 = vmatpush3.bf16.msra.mxu0 %v4090_v34 }
 0x2a1   :  { %3219 = vmatprep.subr.bf16.mxu0 %v3902_v1  ;;  %3246 = vmatpush1.bf16.msra.mxu1 %v4010_v29 }
 0x2a2   :  { %3248 = vmatprep.subr.bf16.mxu1 %v4015_v33 }
 0x2a4   :  { %3221 = vmatpush3.bf16.msra.mxu0 %v4098_v37 }
 0x2a5   :  { %3222 = vmatprep.subr.bf16.mxu0 %v3902_v1  ;;  %3250 = vmatpush1.bf16.msra.mxu1 %v4022_v41 }
 0x2a6   :  { %3252 = vmatprep.subr.bf16.mxu1 %v4025_v42 }
 0x2a8   :  { %3224 = vmatpush3.bf16.msra.mxu0 %v4104_v43 }
 0x2a9   :  { %3225 = vmatprep.subr.bf16.mxu0 %v3902_v1  ;;  %3254 = vmatpush1.bf16.msra.mxu1 %v4032_v50 }
 0x2aa   :  { %3256 = vmatprep.subr.bf16.mxu1 %v4035_v51 }
 0x2ac   :  { %3227 = vmatpush3.bf16.msra.mxu0 %v4110_v46 }
 0x2ad   :  { %3228 = vmatprep.subr.bf16.mxu0 %v3902_v1  ;;  %3258 = vmatpush1.bf16.msra.mxu1 %v4042_v59 }
 0x2ae   :  { %3260 = vmatprep.subr.bf16.mxu1 %v4045_v60 }
 0x2b0   :  { %3230 = vmatpush3.bf16.msra.mxu0 %v4116_v52 }
 0x2b1   :  { %3263 = vmatprep.subr.bf16.mxu0 %v3902_v1  ;;  %3262 = vmatpush1.bf16.msra.mxu1 %v4052_v4 }
 0x2b2   :  { %3287 = vmatprep.subr.bf16.mxu1 %v3902_v1 }
 0x2b3   :  { %2639 = vmatmul.mubr.f32.vlgmr.msra.gmra.mrb[8].mxu0 %v635_v61 }
 0x2b4   :  { %3265 = vmatpush3.bf16.msra.mxu0 %v4012_v30  ;;  %2673 = vmatprep.mubr.msk.f32.mxu0 %vm3903_vm0, %v3901_v0 }
 0x2b5   :  { %3266 = vmatprep.subr.bf16.mxu0 %v3902_v1 }
 0x2b8   :  { %3268 = vmatpush3.bf16.msra.mxu0 %v4018_v38 }
 0x2b9   :  { %3269 = vmatprep.subr.bf16.mxu0 %v3902_v1 }
 0x2bc   :  { %3271 = vmatpush3.bf16.msra.mxu0 %v4028_v47 }
 0x2bd   :  { %3272 = vmatprep.subr.bf16.mxu0 %v3902_v1 }
 0x2c0   :  { %3274 = vmatpush3.bf16.msra.mxu0 %v4038_v56 }
 0x2c1   :  { %3275 = vmatprep.subr.bf16.mxu0 %v3902_v1 }
 0x2c4   :  { %3277 = vmatpush3.bf16.msra.mxu0 %v4048_v63 }
 0x2c5   :  { %3278 = vmatprep.subr.bf16.mxu0 %v3902_v1 }
 0x2c8   :  { %3280 = vmatpush3.bf16.msra.mxu0 %v4056_v8 }
 0x2c9   :  { %3281 = vmatprep.subr.bf16.mxu0 %v3902_v1 }
 0x2cc   :  { %3283 = vmatpush3.bf16.msra.mxu0 %v4069_v19 }
 0x2cd   :  { %3284 = vmatprep.subr.bf16.mxu0 %v3902_v1 }
 0x2d0   :  { %3286 = vmatpush3.bf16.msra.mxu0 %v4080_v27 }
 0x2d1   :  { %3312 = vmatprep.subr.bf16.mxu0 %v3990_v5 }
 0x366   :  { %v709_v49 = vpop.f32.mrb[6].mxu0  ;;  %v780_v62 = vpop.f32.mrb[6].mxu1 }
 0x367   :  { %v711_v2 = vpop.f32.mrb[7].mxu0  ;;  %v2605_v3 = vpop.f32.mrb[7].mxu1  ;;  %v784_v12 = vadd.f32 %v709_v49, %v639_v7  ;;  %v786_v20 = vadd.f32 %v780_v62, %v641_v18 }
 0x368   :  { %v785_v11 = vadd.f32 %v711_v2, %v640_v6 }
 0x369   :  { %v2141_v17 = vmul.f32 -1.442695, %v784_v12  ;;  %v2143_v26 = vmul.f32 -1.442695, %v786_v20  ;;  %v885_v12 = vld [vmem:[#allocation4 + $0x60] sm:$0xff] }
 0x36a   :  { %v2142_v13 = vmul.f32 -1.442695, %v785_v11  ;;  %v886_v11 = vld [vmem:[#allocation4 + $0x68] sm:$0xff] }
 0x36c   :  { %3677 = vpow2.f32 %v2142_v13 }
 0x36d   :  { %3679 = vpow2.f32 %v2141_v17 }
 0x36e   :  { %3681 = vpow2.f32 %v2143_v26 }
 0x376   :  { %v3678_v23 = vpop.eup %3677 }
 0x377   :  { %v3680_v25 = vpop.eup %3679  ;;  %v868_v31 = vadd.f32 1.0, %v3678_v23  ;;  %v887_v23 = vld [vmem:[#allocation4 + $0x70] sm:$0xff] }
 0x378   :  { %v867_v32 = vadd.f32 1.0, %v3680_v25  ;;  %v3682_v44 = vpop.eup %3681 }
 0x379   :  { %3683 = vrcp.f32 %v868_v31  ;;  %v869_v54 = vadd.f32 1.0, %v3682_v44 }
 0x37a   :  { %3685 = vrcp.f32 %v867_v32 }
 0x383   :  { %v3684_v45 = vpop.eup %3683 }
 0x384   :  { %v3686_v48 = vpop.eup %3685  ;;  %v877_v57 = vmul.f32 %v3684_v45, %v4205_v55 }
 0x386   :  { %v853_v36 = vpop.f32.mrb[8].mxu0 }
 0x387   :  { %v857_v39 = vadd.f32 %v853_v36, %v642_v35  ;;  %v2640_v40 = vpop.f32.mrb[9].mxu0 }
 0x389   :  { %3687 = vtanh.f32 %v857_v39  ;;  %v888_v39 = vld [vmem:[#allocation4 + $0x78] sm:$0xff] }
 0x38a   :  { %3689 = vrcp.f32 %v869_v54 }
 0x393   :  { %v3688_v53 = vpop.eup %3687 }
 0x394   :  { %v878_v58 = vmul.f32 %v3688_v53, %v3686_v48  ;;  %v3690_v49 = vpop.eup %3689 }
 0x396   :  { %v4262_v61 = vadd.f32 %v878_v58, %v877_v57 }
 0x398   :  { %3691 = vtanh.f32 %v4262_v61 }
 0x3a2   :  { %v3692_v62 = vpop.eup %3691 }
 0x3a3   :  { %v881_v2 = vmul.f32 %v3692_v62, %v3690_v49 }
 0x3a5   :  { %883 = vst [vmem:[#allocation12 + $0x10] sm:$0xff] %v881_v2  ;;  %954 = vmatmul.mubr.f32.vlgmr.msra.gmra.mrb[8].mxu1 %v881_v2  ;;  %2674 = vmatmul.mubr.f32.vlgmr.msra.gmra.mrb[10].mxu0 %v881_v2 }
 0x3a6   :  { %3289 = vmatpush3.bf16.msra.mxu1 %v4065_v14  ;;  %2708 = vmatprep.mubr.msk.f32.mxu1 %vm3903_vm0, %v3901_v0 }
 0x3a7   :  { %3290 = vmatprep.subr.bf16.mxu1 %v3902_v1  ;;  %3314 = vmatpush1.bf16.msra.mxu0 %v3992_v9 }
 0x3a8   :  { %3316 = vmatprep.subr.bf16.mxu0 %v3994_v10  ;;  %1199 = vmatprep.mubr.f32.mxu0 %v3901_v0 }
 0x3aa   :  { %3292 = vmatpush3.bf16.msra.mxu1 %v4074_v24 }
 0x3ab   :  { %3293 = vmatprep.subr.bf16.mxu1 %v3902_v1  ;;  %3318 = vmatpush1.bf16.msra.mxu0 %v3998_v15 }
 0x3ac   :  { %3320 = vmatprep.subr.bf16.mxu0 %v4001_v16 }
 0x3ae   :  { %3295 = vmatpush3.bf16.msra.mxu1 %v4084_v28 }
 0x3af   :  { %3296 = vmatprep.subr.bf16.mxu1 %v3902_v1  ;;  %3322 = vmatpush1.bf16.msra.mxu0 %v4004_v21 }
 0x3b0   :  { %3324 = vmatprep.subr.bf16.mxu0 %v4007_v22 }
 0x3b2   :  { %3298 = vmatpush3.bf16.msra.mxu1 %v4090_v34 }
 0x3b3   :  { %3299 = vmatprep.subr.bf16.mxu1 %v3902_v1  ;;  %3326 = vmatpush1.bf16.msra.mxu0 %v4010_v29 }
 0x3b4   :  { %3328 = vmatprep.subr.bf16.mxu0 %v4015_v33 }
 0x3b6   :  { %3301 = vmatpush3.bf16.msra.mxu1 %v4098_v37 }
 0x3b7   :  { %3302 = vmatprep.subr.bf16.mxu1 %v3902_v1  ;;  %3330 = vmatpush1.bf16.msra.mxu0 %v4022_v41 }
 0x3b8   :  { %3332 = vmatprep.subr.bf16.mxu0 %v4025_v42 }
 0x3ba   :  { %3304 = vmatpush3.bf16.msra.mxu1 %v4104_v43 }
 0x3bb   :  { %3305 = vmatprep.subr.bf16.mxu1 %v3902_v1  ;;  %3334 = vmatpush1.bf16.msra.mxu0 %v4032_v50 }
 0x3bc   :  { %3336 = vmatprep.subr.bf16.mxu0 %v4035_v51 }
 0x3be   :  { %3307 = vmatpush3.bf16.msra.mxu1 %v4110_v46 }
 0x3bf   :  { %3308 = vmatprep.subr.bf16.mxu1 %v3902_v1  ;;  %3338 = vmatpush1.bf16.msra.mxu0 %v4042_v59 }
 0x3c0   :  { %3340 = vmatprep.subr.bf16.mxu0 %v4045_v60 }
 0x3c2   :  { %3310 = vmatpush3.bf16.msra.mxu1 %v4116_v52 }
 0x3c3   :  { %3343 = vmatprep.subr.bf16.mxu1 %v3902_v1  ;;  %3342 = vmatpush1.bf16.msra.mxu0 %v4052_v4 }
 0x3c4   :  { %3367 = vmatprep.subr.bf16.mxu0 %v3902_v1 }
 0x3c5   :  { %2709 = vmatmul.mubr.f32.vlgmr.msra.gmra.mrb[10].mxu1 %v881_v2 }
 0x3c6   :  { %3345 = vmatpush3.bf16.msra.mxu1 %v4012_v30  ;;  %2743 = vmatprep.mubr.msk.f32.mxu1 %vm3903_vm0, %v3901_v0 }
 0x3c7   :  { %3346 = vmatprep.subr.bf16.mxu1 %v3902_v1 }
 0x3ca   :  { %3348 = vmatpush3.bf16.msra.mxu1 %v4018_v38 }
 0x3cb   :  { %3349 = vmatprep.subr.bf16.mxu1 %v3902_v1 }
 0x3ce   :  { %3351 = vmatpush3.bf16.msra.mxu1 %v4028_v47 }
 0x3cf   :  { %3352 = vmatprep.subr.bf16.mxu1 %v3902_v1 }
 0x3d2   :  { %3354 = vmatpush3.bf16.msra.mxu1 %v4038_v56 }
 0x3d3   :  { %3355 = vmatprep.subr.bf16.mxu1 %v3902_v1 }
 0x3d6   :  { %3357 = vmatpush3.bf16.msra.mxu1 %v4048_v63 }
 0x3d7   :  { %3358 = vmatprep.subr.bf16.mxu1 %v3902_v1 }
 0x3da   :  { %3360 = vmatpush3.bf16.msra.mxu1 %v4056_v8 }
 0x3db   :  { %3361 = vmatprep.subr.bf16.mxu1 %v3902_v1 }
 0x3de   :  { %3363 = vmatpush3.bf16.msra.mxu1 %v4069_v19 }
 0x3df   :  { %3364 = vmatprep.subr.bf16.mxu1 %v3902_v1 }
 0x3e2   :  { %3366 = vmatpush3.bf16.msra.mxu1 %v4080_v27 }
 0x3e3   :  { %3392 = vmatprep.subr.bf16.mxu1 %v3990_v5 }
 0x478   :  { %v955_v55 = vpop.f32.mrb[8].mxu1  ;;  %v1026_v3 = vpop.f32.mrb[10].mxu0 }
 0x479   :  { %v957_v6 = vpop.f32.mrb[9].mxu1  ;;  %v2675_v7 = vpop.f32.mrb[11].mxu0  ;;  %v1030_v17 = vadd.f32 %v955_v55, %v885_v12  ;;  %v1032_v25 = vadd.f32 %v1026_v3, %v887_v23 }
 0x47a   :  { %v1031_v13 = vadd.f32 %v957_v6, %v886_v11 }
 0x47b   :  { %v2144_v20 = vmul.f32 -1.442695, %v1030_v17  ;;  %v2146_v32 = vmul.f32 -1.442695, %v1032_v25  ;;  %v1131_v17 = vld [vmem:[#allocation4 + $0x80] sm:$0xff] }
 0x47c   :  { %v2145_v18 = vmul.f32 -1.442695, %v1031_v13  ;;  %v1132_v13 = vld [vmem:[#allocation4 + $0x88] sm:$0xff] }
 0x47e   :  { %3693 = vpow2.f32 %v2145_v18 }
 0x47f   :  { %3695 = vpow2.f32 %v2144_v20 }
 0x480   :  { %3697 = vpow2.f32 %v2146_v32 }
 0x488   :  { %v3694_v26 = vpop.eup %3693 }
 0x489   :  { %v3696_v31 = vpop.eup %3695  ;;  %v1114_v35 = vadd.f32 1.0, %v3694_v26  ;;  %v1133_v26 = vld [vmem:[#allocation4 + $0x90] sm:$0xff] }
 0x48a   :  { %v1113_v36 = vadd.f32 1.0, %v3696_v31  ;;  %v3698_v48 = vpop.eup %3697 }
 0x48b   :  { %3699 = vrcp.f32 %v1114_v35  ;;  %v1115_v58 = vadd.f32 1.0, %v3698_v48 }
 0x48c   :  { %3701 = vrcp.f32 %v1113_v36 }
 0x495   :  { %v3700_v53 = vpop.eup %3699 }
 0x496   :  { %v3702_v54 = vpop.eup %3701  ;;  %v1123_v49 = vmul.f32 %v3700_v53, %v4262_v61 }
 0x498   :  { %v1099_v40 = vpop.f32.mrb[10].mxu1 }
 0x499   :  { %v1103_v44 = vadd.f32 %v1099_v40, %v888_v39  ;;  %v2710_v45 = vpop.f32.mrb[11].mxu1 }
 0x49b   :  { %3703 = vtanh.f32 %v1103_v44  ;;  %v1134_v44 = vld [vmem:[#allocation4 + $0x98] sm:$0xff] }
 0x49c   :  { %3705 = vrcp.f32 %v1115_v58 }
 0x4a5   :  { %v3704_v57 = vpop.eup %3703 }
 0x4a6   :  { %v1124_v62 = vmul.f32 %v3704_v57, %v3702_v54  ;;  %v3706_v55 = vpop.eup %3705 }
 0x4a8   :  { %v4319_v2 = vadd.f32 %v1124_v62, %v1123_v49 }
 0x4aa   :  { %3707 = vtanh.f32 %v4319_v2 }
 0x4b4   :  { %v3708_v3 = vpop.eup %3707 }
 0x4b5   :  { %v1127_v6 = vmul.f32 %v3708_v3, %v3706_v55 }
 0x4b7   :  { %1129 = vst [vmem:[#allocation12 + $0x18] sm:$0xff] %v1127_v6  ;;  %1200 = vmatmul.mubr.f32.vlgmr.msra.gmra.mrb[12].mxu0 %v1127_v6  ;;  %2744 = vmatmul.mubr.f32.vlgmr.msra.gmra.mrb[12].mxu1 %v1127_v6 }
 0x4b8   :  { %3369 = vmatpush3.bf16.msra.mxu0 %v4065_v14  ;;  %2778 = vmatprep.mubr.msk.f32.mxu0 %vm3903_vm0, %v3901_v0 }
 0x4b9   :  { %3370 = vmatprep.subr.bf16.mxu0 %v3902_v1  ;;  %3394 = vmatpush1.bf16.msra.mxu1 %v3992_v9 }
 0x4ba   :  { %3396 = vmatprep.subr.bf16.mxu1 %v3994_v10  ;;  %1445 = vmatprep.mubr.f32.mxu1 %v3901_v0 }
 0x4bc   :  { %3372 = vmatpush3.bf16.msra.mxu0 %v4074_v24 }
 0x4bd   :  { %3373 = vmatprep.subr.bf16.mxu0 %v3902_v1  ;;  %3398 = vmatpush1.bf16.msra.mxu1 %v3998_v15 }
 0x4be   :  { %3400 = vmatprep.subr.bf16.mxu1 %v4001_v16 }
 0x4c0   :  { %3375 = vmatpush3.bf16.msra.mxu0 %v4084_v28 }
 0x4c1   :  { %3376 = vmatprep.subr.bf16.mxu0 %v3902_v1  ;;  %3402 = vmatpush1.bf16.msra.mxu1 %v4004_v21 }
 0x4c2   :  { %3404 = vmatprep.subr.bf16.mxu1 %v4007_v22 }
 0x4c4   :  { %3378 = vmatpush3.bf16.msra.mxu0 %v4090_v34 }
 0x4c5   :  { %3379 = vmatprep.subr.bf16.mxu0 %v3902_v1  ;;  %3406 = vmatpush1.bf16.msra.mxu1 %v4010_v29 }
 0x4c6   :  { %3408 = vmatprep.subr.bf16.mxu1 %v4015_v33 }
 0x4c8   :  { %3381 = vmatpush3.bf16.msra.mxu0 %v4098_v37 }
 0x4c9   :  { %3382 = vmatprep.subr.bf16.mxu0 %v3902_v1  ;;  %3410 = vmatpush1.bf16.msra.mxu1 %v4022_v41 }
 0x4ca   :  { %3412 = vmatprep.subr.bf16.mxu1 %v4025_v42 }
 0x4cc   :  { %3384 = vmatpush3.bf16.msra.mxu0 %v4104_v43 }
 0x4cd   :  { %3385 = vmatprep.subr.bf16.mxu0 %v3902_v1  ;;  %3414 = vmatpush1.bf16.msra.mxu1 %v4032_v50 }
 0x4ce   :  { %3416 = vmatprep.subr.bf16.mxu1 %v4035_v51 }
 0x4d0   :  { %3387 = vmatpush3.bf16.msra.mxu0 %v4110_v46 }
 0x4d1   :  { %3388 = vmatprep.subr.bf16.mxu0 %v3902_v1  ;;  %3418 = vmatpush1.bf16.msra.mxu1 %v4042_v59 }
 0x4d2   :  { %3420 = vmatprep.subr.bf16.mxu1 %v4045_v60 }
 0x4d4   :  { %3390 = vmatpush3.bf16.msra.mxu0 %v4116_v52 }
 0x4d5   :  { %3423 = vmatprep.subr.bf16.mxu0 %v3902_v1  ;;  %3422 = vmatpush1.bf16.msra.mxu1 %v4052_v4 }
 0x4d6   :  { %3447 = vmatprep.subr.bf16.mxu1 %v3902_v1 }
 0x4d7   :  { %2779 = vmatmul.mubr.f32.vlgmr.msra.gmra.mrb[14].mxu0 %v1127_v6 }
 0x4d8   :  { %3425 = vmatpush3.bf16.msra.mxu0 %v4012_v30  ;;  %2813 = vmatprep.mubr.msk.f32.mxu0 %vm3903_vm0, %v3901_v0 }
 0x4d9   :  { %3426 = vmatprep.subr.bf16.mxu0 %v3902_v1 }
 0x4dc   :  { %3428 = vmatpush3.bf16.msra.mxu0 %v4018_v38 }
 0x4dd   :  { %3429 = vmatprep.subr.bf16.mxu0 %v3902_v1 }
 0x4e0   :  { %3431 = vmatpush3.bf16.msra.mxu0 %v4028_v47 }
 0x4e1   :  { %3432 = vmatprep.subr.bf16.mxu0 %v3902_v1 }
 0x4e4   :  { %3434 = vmatpush3.bf16.msra.mxu0 %v4038_v56 }
 0x4e5   :  { %3435 = vmatprep.subr.bf16.mxu0 %v3902_v1 }
 0x4e8   :  { %3437 = vmatpush3.bf16.msra.mxu0 %v4048_v63 }
 0x4e9   :  { %3438 = vmatprep.subr.bf16.mxu0 %v3902_v1 }
 0x4ec   :  { %3440 = vmatpush3.bf16.msra.mxu0 %v4056_v8 }
 0x4ed   :  { %3441 = vmatprep.subr.bf16.mxu0 %v3902_v1 }
 0x4f0   :  { %3443 = vmatpush3.bf16.msra.mxu0 %v4069_v19 }
 0x4f1   :  { %3444 = vmatprep.subr.bf16.mxu0 %v3902_v1 }
 0x4f4   :  { %3446 = vmatpush3.bf16.msra.mxu0 %v4080_v27 }
 0x4f5   :  { %3472 = vmatprep.subr.bf16.mxu0 %v3990_v5 }
 0x58a   :  { %v1201_v61 = vpop.f32.mrb[12].mxu0  ;;  %v1272_v7 = vpop.f32.mrb[12].mxu1 }
 0x58b   :  { %v1203_v11 = vpop.f32.mrb[13].mxu0  ;;  %v2745_v12 = vpop.f32.mrb[13].mxu1  ;;  %v1276_v20 = vadd.f32 %v1201_v61, %v1131_v17  ;;  %v1278_v31 = vadd.f32 %v1272_v7, %v1133_v26 }
 0x58c   :  { %v1277_v18 = vadd.f32 %v1203_v11, %v1132_v13 }
 0x58d   :  { %v2147_v25 = vmul.f32 -1.442695, %v1276_v20  ;;  %v2149_v36 = vmul.f32 -1.442695, %v1278_v31  ;;  %v1377_v20 = vld [vmem:[#allocation4 + $0xa0] sm:$0xff] }
 0x58e   :  { %v2148_v23 = vmul.f32 -1.442695, %v1277_v18  ;;  %v1378_v18 = vld [vmem:[#allocation4 + $0xa8] sm:$0xff] }
 0x590   :  { %3709 = vpow2.f32 %v2148_v23 }
 0x591   :  { %3711 = vpow2.f32 %v2147_v25 }
 0x592   :  { %3713 = vpow2.f32 %v2149_v36 }
 0x59a   :  { %v3710_v32 = vpop.eup %3709 }
 0x59b   :  { %v3712_v35 = vpop.eup %3711  ;;  %v1360_v39 = vadd.f32 1.0, %v3710_v32  ;;  %v1379_v32 = vld [vmem:[#allocation4 + $0xb0] sm:$0xff] }
 0x59c   :  { %v1359_v40 = vadd.f32 1.0, %v3712_v35  ;;  %v3714_v54 = vpop.eup %3713 }
 0x59d   :  { %3715 = vrcp.f32 %v1360_v39  ;;  %v1361_v62 = vadd.f32 1.0, %v3714_v54 }
 0x59e   :  { %3717 = vrcp.f32 %v1359_v40 }
 0x5a7   :  { %v3716_v57 = vpop.eup %3715 }
 0x5a8   :  { %v3718_v58 = vpop.eup %3717  ;;  %v1369_v55 = vmul.f32 %v3716_v57, %v4319_v2 }
 0x5aa   :  { %v1345_v45 = vpop.f32.mrb[14].mxu0 }
 0x5ab   :  { %v1349_v48 = vadd.f32 %v1345_v45, %v1134_v44  ;;  %v2780_v53 = vpop.f32.mrb[15].mxu0 }
 0x5ad   :  { %3719 = vtanh.f32 %v1349_v48 }
 0x5ae   :  { %3721 = vrcp.f32 %v1361_v62 }
 0x5b7   :  { %v3720_v49 = vpop.eup %3719 }
 0x5b8   :  { %v1370_v3 = vmul.f32 %v3720_v49, %v3718_v58  ;;  %v3722_v61 = vpop.eup %3721 }
 0x5ba   :  { %v4376_v6 = vadd.f32 %v1370_v3, %v1369_v55 }
 0x5bc   :  { %3723 = vtanh.f32 %v4376_v6 }
 0x5c6   :  { %v3724_v7 = vpop.eup %3723 }
 0x5c7   :  { %v1373_v11 = vmul.f32 %v3724_v7, %v3722_v61 }
 0x5c9   :  { %1375 = vst [vmem:[#allocation12 + $0x20] sm:$0xff] %v1373_v11  ;;  %1446 = vmatmul.mubr.f32.vlgmr.msra.gmra.mrb[14].mxu1 %v1373_v11  ;;  %2814 = vmatmul.mubr.f32.vlgmr.msra.gmra.mrb[16].mxu0 %v1373_v11 }
 0x5ca   :  { %3449 = vmatpush3.bf16.msra.mxu1 %v4065_v14  ;;  %2848 = vmatprep.mubr.msk.f32.mxu1 %vm3903_vm0, %v3901_v0 }
 0x5cb   :  { %3450 = vmatprep.subr.bf16.mxu1 %v3902_v1  ;;  %3474 = vmatpush1.bf16.msra.mxu0 %v3992_v9 }
 0x5cc   :  { %3476 = vmatprep.subr.bf16.mxu0 %v3994_v10  ;;  %1691 = vmatprep.mubr.f32.mxu0 %v3901_v0 }
 0x5ce   :  { %3452 = vmatpush3.bf16.msra.mxu1 %v4074_v24 }
 0x5cf   :  { %3453 = vmatprep.subr.bf16.mxu1 %v3902_v1  ;;  %3478 = vmatpush1.bf16.msra.mxu0 %v3998_v15 }
 0x5d0   :  { %3480 = vmatprep.subr.bf16.mxu0 %v4001_v16 }
 0x5d2   :  { %3455 = vmatpush3.bf16.msra.mxu1 %v4084_v28 }
 0x5d3   :  { %3456 = vmatprep.subr.bf16.mxu1 %v3902_v1  ;;  %3482 = vmatpush1.bf16.msra.mxu0 %v4004_v21 }
 0x5d4   :  { %3484 = vmatprep.subr.bf16.mxu0 %v4007_v22 }
 0x5d6   :  { %3458 = vmatpush3.bf16.msra.mxu1 %v4090_v34 }
 0x5d7   :  { %3459 = vmatprep.subr.bf16.mxu1 %v3902_v1  ;;  %3486 = vmatpush1.bf16.msra.mxu0 %v4010_v29 }
 0x5d8   :  { %3488 = vmatprep.subr.bf16.mxu0 %v4015_v33 }
 0x5da   :  { %3461 = vmatpush3.bf16.msra.mxu1 %v4098_v37 }
 0x5db   :  { %3462 = vmatprep.subr.bf16.mxu1 %v3902_v1  ;;  %3490 = vmatpush1.bf16.msra.mxu0 %v4022_v41 }
 0x5dc   :  { %3492 = vmatprep.subr.bf16.mxu0 %v4025_v42 }
 0x5de   :  { %3464 = vmatpush3.bf16.msra.mxu1 %v4104_v43 }
 0x5df   :  { %3465 = vmatprep.subr.bf16.mxu1 %v3902_v1  ;;  %3494 = vmatpush1.bf16.msra.mxu0 %v4032_v50 }
 0x5e0   :  { %3496 = vmatprep.subr.bf16.mxu0 %v4035_v51 }
 0x5e2   :  { %3467 = vmatpush3.bf16.msra.mxu1 %v4110_v46 }
 0x5e3   :  { %3468 = vmatprep.subr.bf16.mxu1 %v3902_v1  ;;  %3498 = vmatpush1.bf16.msra.mxu0 %v4042_v59 }
 0x5e4   :  { %3500 = vmatprep.subr.bf16.mxu0 %v4045_v60 }
 0x5e6   :  { %3470 = vmatpush3.bf16.msra.mxu1 %v4116_v52 }
 0x5e7   :  { %3503 = vmatprep.subr.bf16.mxu1 %v3902_v1  ;;  %3502 = vmatpush1.bf16.msra.mxu0 %v4052_v4 }
 0x5e8   :  { %3527 = vmatprep.subr.bf16.mxu0 %v3902_v1 }
 0x5e9   :  { %2849 = vmatmul.mubr.f32.vlgmr.msra.gmra.mrb[16].mxu1 %v1373_v11 }
 0x5ea   :  { %3505 = vmatpush3.bf16.msra.mxu1 %v4012_v30  ;;  %2883 = vmatprep.mubr.msk.f32.mxu1 %vm3903_vm0, %v3901_v0 }
 0x5eb   :  { %3506 = vmatprep.subr.bf16.mxu1 %v3902_v1 }
 0x5ee   :  { %3508 = vmatpush3.bf16.msra.mxu1 %v4018_v38 }
 0x5ef   :  { %3509 = vmatprep.subr.bf16.mxu1 %v3902_v1 }
 0x5f2   :  { %3511 = vmatpush3.bf16.msra.mxu1 %v4028_v47 }
 0x5f3   :  { %3512 = vmatprep.subr.bf16.mxu1 %v3902_v1 }
 0x5f6   :  { %3514 = vmatpush3.bf16.msra.mxu1 %v4038_v56 }
 0x5f7   :  { %3515 = vmatprep.subr.bf16.mxu1 %v3902_v1 }
 0x5fa   :  { %3517 = vmatpush3.bf16.msra.mxu1 %v4048_v63 }
 0x5fb   :  { %3518 = vmatprep.subr.bf16.mxu1 %v3902_v1 }
 0x5fe   :  { %3520 = vmatpush3.bf16.msra.mxu1 %v4056_v8 }
 0x5ff   :  { %3521 = vmatprep.subr.bf16.mxu1 %v3902_v1 }
 0x602   :  { %3523 = vmatpush3.bf16.msra.mxu1 %v4069_v19 }
 0x603   :  { %3524 = vmatprep.subr.bf16.mxu1 %v3902_v1 }
 0x606   :  { %3526 = vmatpush3.bf16.msra.mxu1 %v4080_v27 }
 0x607   :  { %3552 = vmatprep.subr.bf16.mxu1 %v3990_v5  ;;  %v1380_v5 = vld [vmem:[#allocation4 + $0xb8] sm:$0xff] }
 0x69c   :  { %v1447_v2 = vpop.f32.mrb[14].mxu1  ;;  %v1518_v12 = vpop.f32.mrb[16].mxu0 }
 0x69d   :  { %v1449_v13 = vpop.f32.mrb[15].mxu1  ;;  %v2815_v17 = vpop.f32.mrb[17].mxu0  ;;  %v1522_v25 = vadd.f32 %v1447_v2, %v1377_v20  ;;  %v1524_v35 = vadd.f32 %v1518_v12, %v1379_v32  ;;  %v1869_v32 = vld [vmem:[#allocation4 + $0xe0] sm:$0xff] }
 0x69e   :  { %v1523_v23 = vadd.f32 %v1449_v13, %v1378_v18 }
 0x69f   :  { %v2150_v31 = vmul.f32 -1.442695, %v1522_v25  ;;  %v2152_v40 = vmul.f32 -1.442695, %v1524_v35 }
 0x6a0   :  { %v2151_v26 = vmul.f32 -1.442695, %v1523_v23 }
 0x6a2   :  { %3725 = vpow2.f32 %v2151_v26 }
 0x6a3   :  { %3727 = vpow2.f32 %v2150_v31 }
 0x6a4   :  { %3729 = vpow2.f32 %v2152_v40 }
 0x6ac   :  { %v3726_v36 = vpop.eup %3725 }
 0x6ad   :  { %v3728_v39 = vpop.eup %3727  ;;  %v1606_v44 = vadd.f32 1.0, %v3726_v36 }
 0x6ae   :  { %v1605_v45 = vadd.f32 1.0, %v3728_v39  ;;  %v3730_v57 = vpop.eup %3729 }
 0x6af   :  { %3731 = vrcp.f32 %v1606_v44  ;;  %v1607_v55 = vadd.f32 1.0, %v3730_v57 }
 0x6b0   :  { %3733 = vrcp.f32 %v1605_v45 }
 0x6b9   :  { %v3732_v58 = vpop.eup %3731 }
 0x6ba   :  { %v3734_v49 = vpop.eup %3733  ;;  %v1615_v3 = vmul.f32 %v3732_v58, %v4376_v6 }
 0x6bc   :  { %v1591_v48 = vpop.f32.mrb[16].mxu1 }
 0x6bd   :  { %v1595_v53 = vadd.f32 %v1591_v48, %v1380_v5  ;;  %v2850_v54 = vpop.f32.mrb[17].mxu1  ;;  %v1872_v5 = vld [vmem:[#allocation4 + $0xf8] sm:$0xff] }
 0x6bf   :  { %3735 = vtanh.f32 %v1595_v53 }
 0x6c0   :  { %3737 = vrcp.f32 %v1607_v55 }
 0x6c9   :  { %v3736_v62 = vpop.eup %3735 }
 0x6ca   :  { %v1616_v61 = vmul.f32 %v3736_v62, %v3734_v49  ;;  %v3738_v11 = vpop.eup %3737 }
 0x6cc   :  { %v4433_v7 = vadd.f32 %v1616_v61, %v1615_v3 }
 0x6ce   :  { %3739 = vtanh.f32 %v4433_v7 }
 0x6d8   :  { %v3740_v2 = vpop.eup %3739 }
 0x6d9   :  { %v1619_v12 = vmul.f32 %v3740_v2, %v3738_v11 }
 0x6db   :  { %1621 = vst [vmem:[#allocation12 + $0x28] sm:$0xff] %v1619_v12  ;;  %1692 = vmatmul.mubr.f32.vlgmr.msra.gmra.mrb[18].mxu0 %v1619_v12  ;;  %2884 = vmatmul.mubr.f32.vlgmr.msra.gmra.mrb[18].mxu1 %v1619_v12 }
 0x6dc   :  { %3529 = vmatpush3.bf16.msra.mxu0 %v4065_v14  ;;  %2918 = vmatprep.mubr.msk.f32.mxu0 %vm3903_vm0, %v3901_v0 }
 0x6dd   :  { %3530 = vmatprep.subr.bf16.mxu0 %v3902_v1  ;;  %3554 = vmatpush1.bf16.msra.mxu1 %v3992_v9 }
 0x6de   :  { %3556 = vmatprep.subr.bf16.mxu1 %v3994_v10  ;;  %1937 = vmatprep.mubr.f32.mxu1 %v3901_v0 }
 0x6e0   :  { %3532 = vmatpush3.bf16.msra.mxu0 %v4074_v24 }
 0x6e1   :  { %3533 = vmatprep.subr.bf16.mxu0 %v3902_v1  ;;  %3558 = vmatpush1.bf16.msra.mxu1 %v3998_v15 }
 0x6e2   :  { %3560 = vmatprep.subr.bf16.mxu1 %v4001_v16 }
 0x6e4   :  { %3535 = vmatpush3.bf16.msra.mxu0 %v4084_v28 }
 0x6e5   :  { %3536 = vmatprep.subr.bf16.mxu0 %v3902_v1  ;;  %3562 = vmatpush1.bf16.msra.mxu1 %v4004_v21  ;;  %v1624_v21 = vld [vmem:[#allocation4 + $0xc8] sm:$0xff] }
 0x6e6   :  { %3564 = vmatprep.subr.bf16.mxu1 %v4007_v22  ;;  %v1623_v22 = vld [vmem:[#allocation4 + $0xc0] sm:$0xff] }
 0x6e8   :  { %3538 = vmatpush3.bf16.msra.mxu0 %v4090_v34 }
 0x6e9   :  { %3539 = vmatprep.subr.bf16.mxu0 %v3902_v1  ;;  %3566 = vmatpush1.bf16.msra.mxu1 %v4010_v29 }
 0x6ea   :  { %3568 = vmatprep.subr.bf16.mxu1 %v4015_v33 }
 0x6ec   :  { %3541 = vmatpush3.bf16.msra.mxu0 %v4098_v37 }
 0x6ed   :  { %3542 = vmatprep.subr.bf16.mxu0 %v3902_v1  ;;  %3570 = vmatpush1.bf16.msra.mxu1 %v4022_v41  ;;  %v1625_v41 = vld [vmem:[#allocation4 + $0xd0] sm:$0xff] }
 0x6ee   :  { %3572 = vmatprep.subr.bf16.mxu1 %v4025_v42 }
 0x6f0   :  { %3544 = vmatpush3.bf16.msra.mxu0 %v4104_v43 }
 0x6f1   :  { %3545 = vmatprep.subr.bf16.mxu0 %v3902_v1  ;;  %3574 = vmatpush1.bf16.msra.mxu1 %v4032_v50 }
 0x6f2   :  { %3576 = vmatprep.subr.bf16.mxu1 %v4035_v51 }
 0x6f4   :  { %3547 = vmatpush3.bf16.msra.mxu0 %v4110_v46 }
 0x6f5   :  { %3548 = vmatprep.subr.bf16.mxu0 %v3902_v1  ;;  %3578 = vmatpush1.bf16.msra.mxu1 %v4042_v59 }
 0x6f6   :  { %3580 = vmatprep.subr.bf16.mxu1 %v4045_v60  ;;  %v1626_v60 = vld [vmem:[#allocation4 + $0xd8] sm:$0xff] }
 0x6f8   :  { %3550 = vmatpush3.bf16.msra.mxu0 %v4116_v52 }
 0x6f9   :  { %3583 = vmatprep.subr.bf16.mxu0 %v3902_v1  ;;  %3582 = vmatpush1.bf16.msra.mxu1 %v4052_v4 }
 0x6fa   :  { %3607 = vmatprep.subr.bf16.mxu1 %v3902_v1 }
 0x6fb   :  { %2919 = vmatmul.mubr.f32.vlgmr.msra.gmra.mrb[20].mxu0 %v1619_v12 }
 0x6fc   :  { %3585 = vmatpush3.bf16.msra.mxu0 %v4012_v30  ;;  %2953 = vmatprep.mubr.msk.f32.mxu0 %vm3903_vm0, %v3901_v0 }
 0x6fd   :  { %3586 = vmatprep.subr.bf16.mxu0 %v3902_v1 }
 0x700   :  { %3588 = vmatpush3.bf16.msra.mxu0 %v4018_v38 }
 0x701   :  { %3589 = vmatprep.subr.bf16.mxu0 %v3902_v1 }
 0x704   :  { %3591 = vmatpush3.bf16.msra.mxu0 %v4028_v47 }
 0x705   :  { %3592 = vmatprep.subr.bf16.mxu0 %v3902_v1 }
 0x708   :  { %3594 = vmatpush3.bf16.msra.mxu0 %v4038_v56 }
 0x709   :  { %3595 = vmatprep.subr.bf16.mxu0 %v3902_v1 }
 0x70c   :  { %3597 = vmatpush3.bf16.msra.mxu0 %v4048_v63 }
 0x70d   :  { %3598 = vmatprep.subr.bf16.mxu0 %v3902_v1 }
 0x710   :  { %3600 = vmatpush3.bf16.msra.mxu0 %v4056_v8 }
 0x711   :  { %3601 = vmatprep.subr.bf16.mxu0 %v3902_v1 }
 0x714   :  { %3603 = vmatpush3.bf16.msra.mxu0 %v4069_v19 }
 0x715   :  { %3604 = vmatprep.subr.bf16.mxu0 %v3902_v1 }
 0x718   :  { %3606 = vmatpush3.bf16.msra.mxu0 %v4080_v27 }
 0x7ae   :  { %v1693_v9 = vpop.f32.mrb[18].mxu0  ;;  %v1764_v10 = vpop.f32.mrb[18].mxu1 }
 0x7af   :  { %v1695_v15 = vpop.f32.mrb[19].mxu0  ;;  %v2885_v16 = vpop.f32.mrb[19].mxu1  ;;  %v1768_v30 = vadd.f32 %v1693_v9, %v1623_v22  ;;  %v1770_v42 = vadd.f32 %v1764_v10, %v1625_v41 }
 0x7b0   :  { %v1769_v29 = vadd.f32 %v1695_v15, %v1624_v21 }
 0x7b1   :  { %v2153_v38 = vmul.f32 -1.442695, %v1768_v30  ;;  %v2155_v51 = vmul.f32 -1.442695, %v1770_v42 }
 0x7b2   :  { %v2154_v33 = vmul.f32 -1.442695, %v1769_v29 }
 0x7b4   :  { %3741 = vpow2.f32 %v2154_v33 }
 0x7b5   :  { %3743 = vpow2.f32 %v2153_v38 }
 0x7b6   :  { %3745 = vpow2.f32 %v2155_v51 }
 0x7be   :  { %v3742_v47 = vpop.eup %3741 }
 0x7bf   :  { %v3744_v50 = vpop.eup %3743  ;;  %v1852_v56 = vadd.f32 1.0, %v3742_v47 }
 0x7c0   :  { %v1851_v59 = vadd.f32 1.0, %v3744_v50  ;;  %v3746_v19 = vpop.eup %3745 }
 0x7c1   :  { %3747 = vrcp.f32 %v1852_v56  ;;  %v1853_v17 = vadd.f32 1.0, %v3746_v19 }
 0x7c2   :  { %3749 = vrcp.f32 %v1851_v59 }
 0x7cb   :  { %v3748_v27 = vpop.eup %3747 }
 0x7cc   :  { %v3750_v6 = vpop.eup %3749  ;;  %v1861_v18 = vmul.f32 %v3748_v27, %v4433_v7 }
 0x7ce   :  { %v1837_v63 = vpop.f32.mrb[20].mxu0 }
 0x7cf   :  { %v1841_v4 = vadd.f32 %v1837_v63, %v1626_v60  ;;  %v2920_v8 = vpop.f32.mrb[21].mxu0 }
 0x7d1   :  { %3751 = vtanh.f32 %v1841_v4 }
 0x7d2   :  { %3753 = vrcp.f32 %v1853_v17 }
 0x7db   :  { %v3752_v13 = vpop.eup %3751 }
 0x7dc   :  { %v1862_v20 = vmul.f32 %v3752_v13, %v3750_v6  ;;  %v3754_v25 = vpop.eup %3753 }
 0x7de   :  { %v1863_v23 = vadd.f32 %v1862_v20, %v1861_v18 }
 0x7e0   :  { %3755 = vtanh.f32 %v1863_v23 }
 0x7ea   :  { %v3756_v26 = vpop.eup %3755 }
 0x7eb   :  { %v1865_v31 = vmul.f32 %v3756_v26, %v3754_v25 }
 0x7ed   :  { %1867 = vst [vmem:[#allocation12 + $0x30] sm:$0xff] %v1865_v31  ;;  %1938 = vmatmul.mubr.f32.vlgmr.msra.gmra.mrb[20].mxu1 %v1865_v31  ;;  %2954 = vmatmul.mubr.f32.vlgmr.msra.gmra.mrb[22].mxu0 %v1865_v31 }
 0x7ee   :  { %3609 = vmatpush3.bf16.msra.mxu1 %v4065_v14  ;;  %2988 = vmatprep.mubr.msk.f32.mxu1 %vm3903_vm0, %v3901_v0 }
 0x7ef   :  { %3610 = vmatprep.subr.bf16.mxu1 %v3902_v1 }
 0x7f2   :  { %3612 = vmatpush3.bf16.msra.mxu1 %v4074_v24 }
 0x7f3   :  { %3613 = vmatprep.subr.bf16.mxu1 %v3902_v1 }
 0x7f6   :  { %3615 = vmatpush3.bf16.msra.mxu1 %v4084_v28 }
 0x7f7   :  { %3616 = vmatprep.subr.bf16.mxu1 %v3902_v1 }
 0x7fa   :  { %3618 = vmatpush3.bf16.msra.mxu1 %v4090_v34  ;;  %v1870_v34 = vld [vmem:[#allocation4 + $0xe8] sm:$0xff] }
 0x7fb   :  { %3619 = vmatprep.subr.bf16.mxu1 %v3902_v1 }
 0x7fe   :  { %3621 = vmatpush3.bf16.msra.mxu1 %v4098_v37 }
 0x7ff   :  { %3622 = vmatprep.subr.bf16.mxu1 %v3902_v1 }
 0x802   :  { %3624 = vmatpush3.bf16.msra.mxu1 %v4104_v43  ;;  %v1871_v43 = vld [vmem:[#allocation4 + $0xf0] sm:$0xff] }
 0x803   :  { %3625 = vmatprep.subr.bf16.mxu1 %v3902_v1 }
 0x806   :  { %3627 = vmatpush3.bf16.msra.mxu1 %v4110_v46 }
 0x807   :  { %3628 = vmatprep.subr.bf16.mxu1 %v3902_v1 }
 0x80a   :  { %3630 = vmatpush3.bf16.msra.mxu1 %v4116_v52 }
 0x80d   :  { %2989 = vmatmul.mubr.f32.vlgmr.msra.gmra.mrb[22].mxu1 %v1865_v31 }
 0x8c0   :  { %v1939_v0 = vpop.f32.mrb[20].mxu1  ;;  %v2010_v14 = vpop.f32.mrb[22].mxu0 }
 0x8c1   :  { %v1941_v24 = vpop.f32.mrb[21].mxu1  ;;  %v2955_v28 = vpop.f32.mrb[23].mxu0  ;;  %v2014_v35 = vadd.f32 %v1939_v0, %v1869_v32  ;;  %v2016_v40 = vadd.f32 %v2010_v14, %v1871_v43 }
 0x8c2   :  { %v2015_v37 = vadd.f32 %v1941_v24, %v1870_v34 }
 0x8c3   :  { %v2156_v39 = vmul.f32 -1.442695, %v2014_v35  ;;  %v2158_v1 = vmul.f32 -1.442695, %v2016_v40 }
 0x8c4   :  { %v2157_v36 = vmul.f32 -1.442695, %v2015_v37 }
 0x8c6   :  { %3757 = vpow2.f32 %v2157_v36 }
 0x8c7   :  { %3759 = vpow2.f32 %v2156_v39 }
 0x8c8   :  { %3761 = vpow2.f32 %v2158_v1 }
 0x8d0   :  { %v3758_v46 = vpop.eup %3757 }
 0x8d1   :  { %v3760_v44 = vpop.eup %3759  ;;  %v2098_v45 = vadd.f32 1.0, %v3758_v46 }
 0x8d2   :  { %v2097_v52 = vadd.f32 1.0, %v3760_v44  ;;  %v3762_v57 = vpop.eup %3761 }
 0x8d3   :  { %3763 = vrcp.f32 %v2098_v45  ;;  %v2099_v55 = vadd.f32 1.0, %v3762_v57 }
 0x8d4   :  { %3765 = vrcp.f32 %v2097_v52 }
 0x8dd   :  { %v3764_v58 = vpop.eup %3763 }
 0x8de   :  { %v3766_v49 = vpop.eup %3765  ;;  %v2107_v3 = vmul.f32 %v3764_v58, %v1863_v23 }
 0x8e0   :  { %v2083_v48 = vpop.f32.mrb[22].mxu1 }
 0x8e1   :  { %v2087_v53 = vadd.f32 %v2083_v48, %v1872_v5  ;;  %v2990_v54 = vpop.f32.mrb[23].mxu1 }
 0x8e3   :  { %3767 = vtanh.f32 %v2087_v53 }
 0x8e4   :  { %3769 = vrcp.f32 %v2099_v55 }
 0x8ed   :  { %v3768_v62 = vpop.eup %3767 }
 0x8ee   :  { %v2108_v61 = vmul.f32 %v3768_v62, %v3766_v49  ;;  %v3770_v11 = vpop.eup %3769 }
 0x8f0   :  { %v2109_v7 = vadd.f32 %v2108_v61, %v2107_v3 }
 0x8f2   :  { %3771 = vtanh.f32 %v2109_v7 }
 0x8fc   :  { %v3772_v2 = vpop.eup %3771 }
 0x8fd   :  { %v2111_v12 = vmul.f32 %v3772_v2, %v3770_v11 }
 0x8ff   :  { %2113 = vst [vmem:[#allocation12 + $0x38] sm:$0xff] %v2111_v12 }
 0x900   :  { %3872 = shalt.err (!%p3869_p8)
}
 0x901   :  { %s3873_s23 = scalar_lea.hbm %s4526_s5, 1024 }
 0x902   :  { %p3874_p9 = scmp.ne.s32.totalorder %s4526_s5, %s3873_s23  ;;  %p3877_p10 = scmp.lt.u32.totalorder %s3873_s23, %s4526_s5 }
 0x904   :  { %p3879_p11 = pnand %p3877_p10, %p3874_p9 }
 0x906   :  { %3882 = shalt.err (!%p3879_p11)
}
 0x907   :  { %2127 = dma.vmem_to_hbm [thread:$0]  %s2122_s19, 1024, %s4526_s5, [#allocation6], %s3898_s0, %s3898_s0, %s3899_s30  }
 0x908   :  { %3889 = dma.done.wait [#allocation6], 1024  }
 0x909   :  { %3890 = vsyncadd [#allocation6], 4294966272 }
 0x90a   :  { %2131 = vsyncpa [#allocation5], 1 }
 0x90b   :  { %2132 = vsyncpa [#allocation8], 1 }
 0x90c   :  { %2133 = vsyncpa [#allocation11], 1 }
 0x90d   :  { %2134 = vsyncpa [#allocation6], 1 }

</bundles_post_ra>
